<compile_context>
chip_gen: v7x
topology: tpu7x:2x2x1
jax: 0.10.0
libtpu: 0.0.40
codegen_flags: <defaults>
</compile_context>

<pallas_src>
import functools

import jax
import jax.numpy as jnp
import numpy as np
from jax import lax
from jax.experimental import pallas as pl
from jax.experimental.pallas import tpu as pltpu

BN_EPS = 1e-5


# ----------------------------------------------------------------------------
# Fused DenseBlock kernel: runs all layers for one image of the batch.
# ----------------------------------------------------------------------------
def _dense_block_kernel(x_ref, masks_ref, *refs, nb_layers, growth, width):
    # refs = (scale_0, shift_0, w_0, ..., scale_{L-1}, shift_{L-1}, w_{L-1},
    #         o_ref, apad_ref)
    n_p = 3 * nb_layers
    param_refs = refs[:n_p]
    o_ref = refs[n_p]          # (c_total, HW) f32 — doubles as resident slab
    apad_ref = refs[n_p + 1]   # (c_in_max, HW + 2*(W+1)) bf16, zero-guarded

    c0, hw = x_ref.shape
    pad = width + 1

    # Zero the guard lanes (W+1 on each side).  Interior writes below never
    # touch them, so they supply the conv's vertical zero padding for every
    # layer; zeroing per grid step keeps this correct under any grid
    # partitioning across TensorCores.
    guard = jnp.zeros((apad_ref.shape[0], pad), apad_ref.dtype)
    apad_ref[:, :pad] = guard
    apad_ref[:, pad + hw:] = guard

    # Seed the channel-major output slab with the block input (rows 0..c0).
    o_ref[:c0, :] = x_ref[...].astype(o_ref.dtype)

    c_in = c0
    for i in range(nb_layers):
        scale = param_refs[3 * i][...]       # (c_in, 1)  gamma / sqrt(var+eps)
        shift = param_refs[3 * i + 1][...]   # (c_in, 1)  beta - mean*scale
        w_ref = param_refs[3 * i + 2]        # (9, growth, c_in) bf16

        # BatchNorm (eval) + ReLU in f32 (v5e has no bf16 VALU); the single
        # f32->bf16 cast is fused into the padded-buffer store.
        a = jnp.maximum(o_ref[:c_in, :] * scale + shift, 0.0)
        apad_ref[:c_in, pad:pad + hw] = a.astype(apad_ref.dtype)

        # 3x3 conv = nine statically-offset window reads of the flat padded
        # activation, each fed straight into a (growth,c_in)x(c_in,HW) MXU
        # matmul; accumulate in f32 registers.  Horizontal taps need a column
        # mask (the flat pitch-W layout wraps x==0 / x==W-1 reads into the
        # neighbouring row); vertical overflow lands in the zero guards.
        acc = jnp.zeros((growth, hw), jnp.float32)
        t = 0
        for dy in (-1, 0, 1):
            for dx in (-1, 0, 1):
                start = pad + dy * width + dx
                win = apad_ref[:c_in, start:start + hw]
                if dx == -1:
                    win = win * masks_ref[0:1, :]
                elif dx == 1:
                    win = win * masks_ref[1:2, :]
                acc = acc + jnp.dot(w_ref[t], win,
                                    preferred_element_type=jnp.float32)
                t += 1

        # Dense connectivity: new features become the next rows of the slab.
        o_ref[c_in:c_in + growth, :] = acc.astype(o_ref.dtype)
        c_in += growth


# ----------------------------------------------------------------------------
# One-time parameter prep (hoisted out of the per-call path).
# ----------------------------------------------------------------------------
def prepare_dense_block_params(params, H, W):
    # Column masks for the flat (pitch-W) padded layout: dx=-1 taps must zero
    # x==0 outputs, dx=+1 taps must zero x==W-1 outputs.
    col = np.tile(np.arange(W), H)
    masks_np = np.stack([(col != 0), (col != W - 1)]).astype(np.float32)
    masks = jnp.asarray(masks_np, dtype=jnp.bfloat16)          # (2, H*W)

    layers = []
    for p in params:
        c_in, g = p["conv_w"].shape[2], p["conv_w"].shape[3]
        scale = (p["bn_w"] / jnp.sqrt(p["bn_var"] + BN_EPS)).astype(jnp.float32)
        shift = (p["bn_b"] - p["bn_mean"] * scale).astype(jnp.float32)
        # (3,3,c_in,g) -> (9, g, c_in): tap-major, out-channel, in-channel.
        w_r = jnp.transpose(p["conv_w"], (0, 1, 3, 2)).reshape(9, g, c_in)
        layers.append((scale.reshape(c_in, 1), shift.reshape(c_in, 1),
                       w_r.astype(jnp.bfloat16)))
    return {"masks": masks, "layers": layers}


# ----------------------------------------------------------------------------
# Wrapper: NCHW in, NCHW out (reshape only — no transposes).
# ----------------------------------------------------------------------------
def dense_block_forward(x_nchw, prepared):
    N, c0, H, W = x_nchw.shape
    HW = H * W
    layers = prepared["layers"]
    L = len(layers)
    g = layers[0][2].shape[1]
    c_total = c0 + L * g
    c_in_max = c0 + (L - 1) * g

    x = x_nchw.reshape(N, c0, HW)          # NCHW is already channel-major

    in_specs = [
        pl.BlockSpec((None, c0, HW), lambda n: (n, 0, 0)),   # x (one image)
        pl.BlockSpec((2, HW), lambda n: (0, 0)),             # column masks
    ]
    flat_params = []
    for (scale, shift, w_r) in layers:
        c_in = scale.shape[0]
        flat_params += [scale, shift, w_r]
        in_specs += [
            pl.BlockSpec((c_in, 1), lambda n: (0, 0)),
            pl.BlockSpec((c_in, 1), lambda n: (0, 0)),
            pl.BlockSpec((9, g, c_in), lambda n: (0, 0, 0)),
        ]

    kernel = functools.partial(_dense_block_kernel,
                               nb_layers=L, growth=g, width=W)

    out = pl.pallas_call(
        kernel,
        out_shape=jax.ShapeDtypeStruct((N, c_total, HW), x_nchw.dtype),
        grid_spec=pltpu.PrefetchScalarGridSpec(
            num_scalar_prefetch=0,
            grid=(N,),
            in_specs=in_specs,
            out_specs=pl.BlockSpec((None, c_total, HW), lambda n: (n, 0, 0)),
            scratch_shapes=[
                # Flat, zero-guarded bf16 activation buffer (pitch W).
                pltpu.VMEM((c_in_max, HW + 2 * (W + 1)), jnp.bfloat16),
            ],
        ),
        compiler_params=pltpu.CompilerParams(
            dimension_semantics=("parallel",),
            vmem_limit_bytes=32 * 1024 * 1024,
        ),
    )(x, prepared["masks"], *flat_params)

    return out.reshape(N, c_total, H, W)   # already NCHW — reshape only


def init_dense_block_params(key, nb_layers, in_planes, growth_rate):
    params = []
    for i in range(nb_layers):
        c_in = in_planes + i * growth_rate
        k = jax.random.fold_in(key, i)
        k_w, k_g, k_b, k_m, k_v = jax.random.split(k, 5)
        conv_w = jax.random.normal(k_w, (3, 3, c_in, growth_rate), jnp.float32)
        conv_w = conv_w * np.sqrt(2.0 / (9.0 * c_in))
        params.append(dict(
            conv_w=conv_w,
            bn_w=1.0 + 0.1 * jax.random.normal(k_g, (c_in,), jnp.float32),
            bn_b=0.1 * jax.random.normal(k_b, (c_in,), jnp.float32),
            bn_mean=0.1 * jax.random.normal(k_m, (c_in,), jnp.float32),
            bn_var=jax.random.uniform(k_v, (c_in,), jnp.float32, 0.5, 1.5),
        ))
    return params


# Pure-JAX reference (eval-mode BN; conv fed bf16 inputs with f32
# accumulation, matching the kernel's MXU precision choice).
def dense_block_reference(x_nchw, params):
    x = jnp.transpose(x_nchw, (0, 2, 3, 1))
    for p in params:
        scale = p["bn_w"] / jnp.sqrt(p["bn_var"] + BN_EPS)
        shift = p["bn_b"] - p["bn_mean"] * scale
        a = jnp.maximum(x * scale + shift, 0.0)
        out = lax.conv_general_dilated(
            a.astype(jnp.bfloat16), p["conv_w"].astype(jnp.bfloat16),
            window_strides=(1, 1), padding="SAME",
            dimension_numbers=("NHWC", "HWIO", "NHWC"),
            preferred_element_type=jnp.float32,
        )
        x = jnp.concatenate([x, out], axis=-1)
    return jnp.transpose(x, (0, 3, 1, 2))


if __name__ == "__main__":
    # Small DenseBlock: nb_layers=3, in_planes=4, growth_rate=4, dropRate=0.0
    nb_layers, in_planes, growth_rate = 3, 4, 4
    N, H, W = 2, 16, 16

    key = jax.random.PRNGKey(0)
    k_x, k_p = jax.random.split(key)
    x = jax.random.normal(k_x, (N, in_planes, H, W), jnp.float32)  # NCHW
    params = init_dense_block_params(k_p, nb_layers, in_planes, growth_rate)

    prepared = prepare_dense_block_params(params, H, W)   # hoisted param prep
    fwd = jax.jit(dense_block_forward)

    y = jax.block_until_ready(fwd(x, prepared))

    expected_c = in_planes + nb_layers * growth_rate
    assert y.shape == (N, expected_c, H, W), y.shape

    y_ref = jax.block_until_ready(dense_block_reference(x, params))
    np.testing.assert_allclose(np.asarray(y), np.asarray(y_ref),
                               rtol=1e-2, atol=1e-2)

    print("KERNEL_OK")
</pallas_src>

<mosaic_0001>
module attributes {stable_mosaic.version = 11 : i64} {
  func.func @_dense_block_kernel(%arg0: i32, %arg1: memref<1x4x256xf32, #tpu.memory_space<vmem>>, %arg2: memref<2x256xbf16, #tpu.memory_space<vmem>>, %arg3: memref<4x1xf32, #tpu.memory_space<vmem>>, %arg4: memref<4x1xf32, #tpu.memory_space<vmem>>, %arg5: memref<9x4x4xbf16, #tpu.memory_space<vmem>>, %arg6: memref<8x1xf32, #tpu.memory_space<vmem>>, %arg7: memref<8x1xf32, #tpu.memory_space<vmem>>, %arg8: memref<9x4x8xbf16, #tpu.memory_space<vmem>>, %arg9: memref<12x1xf32, #tpu.memory_space<vmem>>, %arg10: memref<12x1xf32, #tpu.memory_space<vmem>>, %arg11: memref<9x4x12xbf16, #tpu.memory_space<vmem>>, %arg12: memref<1x16x256xf32, #tpu.memory_space<vmem>>, %arg13: memref<12x290xbf16, #tpu.memory_space<vmem>>) attributes {dimension_semantics = [#tpu.dimension_semantics<parallel>], iteration_bounds = array<i64: 2>, scalar_prefetch = 0 : i64, scratch_operands = 1 : i64, tpu.core_type = #tpu.core_type<tc>, window_params = [{transform_indices = @transform_0, window_bounds = array<i64: 1, 4, 256>}, {pipeline_mode = #tpu.pipeline_mode<synchronous>, transform_indices = @transform_1, window_bounds = array<i64: 2, 256>}, {pipeline_mode = #tpu.pipeline_mode<synchronous>, transform_indices = @transform_2, window_bounds = array<i64: 4, 1>}, {pipeline_mode = #tpu.pipeline_mode<synchronous>, transform_indices = @transform_3, window_bounds = array<i64: 4, 1>}, {pipeline_mode = #tpu.pipeline_mode<synchronous>, transform_indices = @transform_4, window_bounds = array<i64: 9, 4, 4>}, {pipeline_mode = #tpu.pipeline_mode<synchronous>, transform_indices = @transform_5, window_bounds = array<i64: 8, 1>}, {pipeline_mode = #tpu.pipeline_mode<synchronous>, transform_indices = @transform_6, window_bounds = array<i64: 8, 1>}, {pipeline_mode = #tpu.pipeline_mode<synchronous>, transform_indices = @transform_7, window_bounds = array<i64: 9, 4, 8>}, {pipeline_mode = #tpu.pipeline_mode<synchronous>, transform_indices = @transform_8, window_bounds = array<i64: 12, 1>}, {pipeline_mode = #tpu.pipeline_mode<synchronous>, transform_indices = @transform_9, window_bounds = array<i64: 12, 1>}, {pipeline_mode = #tpu.pipeline_mode<synchronous>, transform_indices = @transform_10, window_bounds = array<i64: 9, 4, 12>}, {transform_indices = @transform_11, window_bounds = array<i64: 1, 16, 256>}]} {
    %cst = arith.constant 0.000000e+00 : bf16
    %0 = vector.broadcast %cst : bf16 to vector<12x17xbf16>
    %c0 = arith.constant 0 : index
    %c0_0 = arith.constant 0 : index
    %1 = vector.load %arg13[%c0, %c0_0] : memref<12x290xbf16, #tpu.memory_space<vmem>>, vector<12x17xbf16>
    tpu.vector_store %arg13[%c0, %c0_0], %0 {strides = array<i32>} : memref<12x290xbf16, #tpu.memory_space<vmem>>, vector<12x17xbf16>,
    %c0_1 = arith.constant 0 : index
    %c273 = arith.constant 273 : index
    %2 = vector.load %arg13[%c0_1, %c273] : memref<12x290xbf16, #tpu.memory_space<vmem>>, vector<12x17xbf16>
    tpu.vector_store %arg13[%c0_1, %c273], %0 {strides = array<i32>} : memref<12x290xbf16, #tpu.memory_space<vmem>>, vector<12x17xbf16>,
    %c0_2 = arith.constant 0 : index
    %c0_3 = arith.constant 0 : index
    %c0_4 = arith.constant 0 : index
    %3 = vector.load %arg1[%c0_2, %c0_3, %c0_4] : memref<1x4x256xf32, #tpu.memory_space<vmem>>, vector<1x4x256xf32>
    %4 = vector.shape_cast %3 : vector<1x4x256xf32> to vector<4x256xf32>
    %c0_5 = arith.constant 0 : index
    %c0_6 = arith.constant 0 : index
    %c0_7 = arith.constant 0 : index
    %5 = vector.load %arg12[%c0_5, %c0_6, %c0_7] : memref<1x16x256xf32, #tpu.memory_space<vmem>>, vector<1x4x256xf32>
    %6 = vector.shape_cast %5 : vector<1x4x256xf32> to vector<4x256xf32>
    %7 = vector.shape_cast %4 : vector<4x256xf32> to vector<1x4x256xf32>
    tpu.vector_store %arg12[%c0_5, %c0_6, %c0_7], %7 {strides = array<i32>} : memref<1x16x256xf32, #tpu.memory_space<vmem>>, vector<1x4x256xf32>,
    %c0_8 = arith.constant 0 : index
    %c0_9 = arith.constant 0 : index
    %8 = vector.load %arg3[%c0_8, %c0_9] : memref<4x1xf32, #tpu.memory_space<vmem>>, vector<4x1xf32>
    %c0_10 = arith.constant 0 : index
    %c0_11 = arith.constant 0 : index
    %9 = vector.load %arg4[%c0_10, %c0_11] : memref<4x1xf32, #tpu.memory_space<vmem>>, vector<4x1xf32>
    %c0_12 = arith.constant 0 : index
    %c0_13 = arith.constant 0 : index
    %c0_14 = arith.constant 0 : index
    %10 = vector.load %arg12[%c0_12, %c0_13, %c0_14] : memref<1x16x256xf32, #tpu.memory_space<vmem>>, vector<1x4x256xf32>
    %11 = vector.shape_cast %10 : vector<1x4x256xf32> to vector<4x256xf32>
    %12 = vector.broadcast %8 : vector<4x1xf32> to vector<4x256xf32>
    %13 = arith.mulf %11, %12 : vector<4x256xf32>
    %14 = vector.broadcast %9 : vector<4x1xf32> to vector<4x256xf32>
    %15 = arith.addf %13, %14 : vector<4x256xf32>
    %cst_15 = arith.constant 0.000000e+00 : f32
    %16 = vector.broadcast %cst_15 : f32 to vector<4x256xf32>
    %17 = arith.maximumf %15, %16 : vector<4x256xf32>
    %18 = arith.truncf %17 : vector<4x256xf32> to vector<4x256xbf16>
    %c0_16 = arith.constant 0 : index
    %c17 = arith.constant 17 : index
    %19 = vector.load %arg13[%c0_16, %c17] : memref<12x290xbf16, #tpu.memory_space<vmem>>, vector<4x256xbf16>
    tpu.vector_store %arg13[%c0_16, %c17], %18 {strides = array<i32>} : memref<12x290xbf16, #tpu.memory_space<vmem>>, vector<4x256xbf16>,
    %cst_17 = arith.constant 0.000000e+00 : f32
    %20 = vector.broadcast %cst_17 : f32 to vector<4x256xf32>
    %c0_18 = arith.constant 0 : index
    %c0_19 = arith.constant 0 : index
    %21 = vector.load %arg13[%c0_18, %c0_19] : memref<12x290xbf16, #tpu.memory_space<vmem>>, vector<4x256xbf16>
    %c0_20 = arith.constant 0 : index
    %c0_21 = arith.constant 0 : index
    %22 = vector.load %arg2[%c0_20, %c0_21] : memref<2x256xbf16, #tpu.memory_space<vmem>>, vector<1x256xbf16>
    %23 = vector.broadcast %22 : vector<1x256xbf16> to vector<4x256xbf16>
    %24 = arith.mulf %21, %23 : vector<4x256xbf16>
    %c0_22 = arith.constant 0 : index
    %c0_23 = arith.constant 0 : index
    %c0_24 = arith.constant 0 : index
    %25 = vector.load %arg5[%c0_22, %c0_23, %c0_24] : memref<9x4x4xbf16, #tpu.memory_space<vmem>>, vector<1x4x4xbf16>
    %26 = vector.shape_cast %25 : vector<1x4x4xbf16> to vector<4x4xbf16>
    %cst_25 = arith.constant dense<0.000000e+00> : vector<4x256xf32>
    %27 = tpu.matmul %26, %24, %cst_25 {dimension_numbers = #tpu.dot_dimension_numbers<[1], [0], [0], [1], [0, 0, 1, 1], [], []>} : vector<4x4xbf16>, vector<4x256xbf16>, vector<4x256xf32> -> vector<4x256xf32>
    %28 = arith.addf %20, %27 : vector<4x256xf32>
    %c0_26 = arith.constant 0 : index
    %c1 = arith.constant 1 : index
    %29 = vector.load %arg13[%c0_26, %c1] : memref<12x290xbf16, #tpu.memory_space<vmem>>, vector<4x256xbf16>
    %c1_27 = arith.constant 1 : index
    %c0_28 = arith.constant 0 : index
    %c0_29 = arith.constant 0 : index
    %30 = vector.load %arg5[%c1_27, %c0_28, %c0_29] : memref<9x4x4xbf16, #tpu.memory_space<vmem>>, vector<1x4x4xbf16>
    %31 = vector.shape_cast %30 : vector<1x4x4xbf16> to vector<4x4xbf16>
    %cst_30 = arith.constant dense<0.000000e+00> : vector<4x256xf32>
    %32 = tpu.matmul %31, %29, %cst_30 {dimension_numbers = #tpu.dot_dimension_numbers<[1], [0], [0], [1], [0, 0, 1, 1], [], []>} : vector<4x4xbf16>, vector<4x256xbf16>, vector<4x256xf32> -> vector<4x256xf32>
    %33 = arith.addf %28, %32 : vector<4x256xf32>
    %c0_31 = arith.constant 0 : index
    %c2 = arith.constant 2 : index
    %34 = vector.load %arg13[%c0_31, %c2] : memref<12x290xbf16, #tpu.memory_space<vmem>>, vector<4x256xbf16>
    %c1_32 = arith.constant 1 : index
    %c0_33 = arith.constant 0 : index
    %35 = vector.load %arg2[%c1_32, %c0_33] : memref<2x256xbf16, #tpu.memory_space<vmem>>, vector<1x256xbf16>
    %36 = vector.broadcast %35 : vector<1x256xbf16> to vector<4x256xbf16>
    %37 = arith.mulf %34, %36 : vector<4x256xbf16>
    %c2_34 = arith.constant 2 : index
    %c0_35 = arith.constant 0 : index
    %c0_36 = arith.constant 0 : index
    %38 = vector.load %arg5[%c2_34, %c0_35, %c0_36] : memref<9x4x4xbf16, #tpu.memory_space<vmem>>, vector<1x4x4xbf16>
    %39 = vector.shape_cast %38 : vector<1x4x4xbf16> to vector<4x4xbf16>
    %cst_37 = arith.constant dense<0.000000e+00> : vector<4x256xf32>
    %40 = tpu.matmul %39, %37, %cst_37 {dimension_numbers = #tpu.dot_dimension_numbers<[1], [0], [0], [1], [0, 0, 1, 1], [], []>} : vector<4x4xbf16>, vector<4x256xbf16>, vector<4x256xf32> -> vector<4x256xf32>
    %41 = arith.addf %33, %40 : vector<4x256xf32>
    %c0_38 = arith.constant 0 : index
    %c16 = arith.constant 16 : index
    %42 = vector.load %arg13[%c0_38, %c16] : memref<12x290xbf16, #tpu.memory_space<vmem>>, vector<4x256xbf16>
    %c0_39 = arith.constant 0 : index
    %c0_40 = arith.constant 0 : index
    %43 = vector.load %arg2[%c0_39, %c0_40] : memref<2x256xbf16, #tpu.memory_space<vmem>>, vector<1x256xbf16>
    %44 = vector.broadcast %43 : vector<1x256xbf16> to vector<4x256xbf16>
    %45 = arith.mulf %42, %44 : vector<4x256xbf16>
    %c3 = arith.constant 3 : index
    %c0_41 = arith.constant 0 : index
    %c0_42 = arith.constant 0 : index
    %46 = vector.load %arg5[%c3, %c0_41, %c0_42] : memref<9x4x4xbf16, #tpu.memory_space<vmem>>, vector<1x4x4xbf16>
    %47 = vector.shape_cast %46 : vector<1x4x4xbf16> to vector<4x4xbf16>
    %cst_43 = arith.constant dense<0.000000e+00> : vector<4x256xf32>
    %48 = tpu.matmul %47, %45, %cst_43 {dimension_numbers = #tpu.dot_dimension_numbers<[1], [0], [0], [1], [0, 0, 1, 1], [], []>} : vector<4x4xbf16>, vector<4x256xbf16>, vector<4x256xf32> -> vector<4x256xf32>
    %49 = arith.addf %41, %48 : vector<4x256xf32>
    %c0_44 = arith.constant 0 : index
    %c17_45 = arith.constant 17 : index
    %50 = vector.load %arg13[%c0_44, %c17_45] : memref<12x290xbf16, #tpu.memory_space<vmem>>, vector<4x256xbf16>
    %c4 = arith.constant 4 : index
    %c0_46 = arith.constant 0 : index
    %c0_47 = arith.constant 0 : index
    %51 = vector.load %arg5[%c4, %c0_46, %c0_47] : memref<9x4x4xbf16, #tpu.memory_space<vmem>>, vector<1x4x4xbf16>
    %52 = vector.shape_cast %51 : vector<1x4x4xbf16> to vector<4x4xbf16>
    %cst_48 = arith.constant dense<0.000000e+00> : vector<4x256xf32>
    %53 = tpu.matmul %52, %50, %cst_48 {dimension_numbers = #tpu.dot_dimension_numbers<[1], [0], [0], [1], [0, 0, 1, 1], [], []>} : vector<4x4xbf16>, vector<4x256xbf16>, vector<4x256xf32> -> vector<4x256xf32>
    %54 = arith.addf %49, %53 : vector<4x256xf32>
    %c0_49 = arith.constant 0 : index
    %c18 = arith.constant 18 : index
    %55 = vector.load %arg13[%c0_49, %c18] : memref<12x290xbf16, #tpu.memory_space<vmem>>, vector<4x256xbf16>
    %c1_50 = arith.constant 1 : index
    %c0_51 = arith.constant 0 : index
    %56 = vector.load %arg2[%c1_50, %c0_51] : memref<2x256xbf16, #tpu.memory_space<vmem>>, vector<1x256xbf16>
    %57 = vector.broadcast %56 : vector<1x256xbf16> to vector<4x256xbf16>
    %58 = arith.mulf %55, %57 : vector<4x256xbf16>
    %c5 = arith.constant 5 : index
    %c0_52 = arith.constant 0 : index
    %c0_53 = arith.constant 0 : index
    %59 = vector.load %arg5[%c5, %c0_52, %c0_53] : memref<9x4x4xbf16, #tpu.memory_space<vmem>>, vector<1x4x4xbf16>
    %60 = vector.shape_cast %59 : vector<1x4x4xbf16> to vector<4x4xbf16>
    %cst_54 = arith.constant dense<0.000000e+00> : vector<4x256xf32>
    %61 = tpu.matmul %60, %58, %cst_54 {dimension_numbers = #tpu.dot_dimension_numbers<[1], [0], [0], [1], [0, 0, 1, 1], [], []>} : vector<4x4xbf16>, vector<4x256xbf16>, vector<4x256xf32> -> vector<4x256xf32>
    %62 = arith.addf %54, %61 : vector<4x256xf32>
    %c0_55 = arith.constant 0 : index
    %c32 = arith.constant 32 : index
    %63 = vector.load %arg13[%c0_55, %c32] : memref<12x290xbf16, #tpu.memory_space<vmem>>, vector<4x256xbf16>
    %c0_56 = arith.constant 0 : index
    %c0_57 = arith.constant 0 : index
    %64 = vector.load %arg2[%c0_56, %c0_57] : memref<2x256xbf16, #tpu.memory_space<vmem>>, vector<1x256xbf16>
    %65 = vector.broadcast %64 : vector<1x256xbf16> to vector<4x256xbf16>
    %66 = arith.mulf %63, %65 : vector<4x256xbf16>
    %c6 = arith.constant 6 : index
    %c0_58 = arith.constant 0 : index
    %c0_59 = arith.constant 0 : index
    %67 = vector.load %arg5[%c6, %c0_58, %c0_59] : memref<9x4x4xbf16, #tpu.memory_space<vmem>>, vector<1x4x4xbf16>
    %68 = vector.shape_cast %67 : vector<1x4x4xbf16> to vector<4x4xbf16>
    %cst_60 = arith.constant dense<0.000000e+00> : vector<4x256xf32>
    %69 = tpu.matmul %68, %66, %cst_60 {dimension_numbers = #tpu.dot_dimension_numbers<[1], [0], [0], [1], [0, 0, 1, 1], [], []>} : vector<4x4xbf16>, vector<4x256xbf16>, vector<4x256xf32> -> vector<4x256xf32>
    %70 = arith.addf %62, %69 : vector<4x256xf32>
    %c0_61 = arith.constant 0 : index
    %c33 = arith.constant 33 : index
    %71 = vector.load %arg13[%c0_61, %c33] : memref<12x290xbf16, #tpu.memory_space<vmem>>, vector<4x256xbf16>
    %c7 = arith.constant 7 : index
    %c0_62 = arith.constant 0 : index
    %c0_63 = arith.constant 0 : index
    %72 = vector.load %arg5[%c7, %c0_62, %c0_63] : memref<9x4x4xbf16, #tpu.memory_space<vmem>>, vector<1x4x4xbf16>
    %73 = vector.shape_cast %72 : vector<1x4x4xbf16> to vector<4x4xbf16>
    %cst_64 = arith.constant dense<0.000000e+00> : vector<4x256xf32>
    %74 = tpu.matmul %73, %71, %cst_64 {dimension_numbers = #tpu.dot_dimension_numbers<[1], [0], [0], [1], [0, 0, 1, 1], [], []>} : vector<4x4xbf16>, vector<4x256xbf16>, vector<4x256xf32> -> vector<4x256xf32>
    %75 = arith.addf %70, %74 : vector<4x256xf32>
    %c0_65 = arith.constant 0 : index
    %c34 = arith.constant 34 : index
    %76 = vector.load %arg13[%c0_65, %c34] : memref<12x290xbf16, #tpu.memory_space<vmem>>, vector<4x256xbf16>
    %c1_66 = arith.constant 1 : index
    %c0_67 = arith.constant 0 : index
    %77 = vector.load %arg2[%c1_66, %c0_67] : memref<2x256xbf16, #tpu.memory_space<vmem>>, vector<1x256xbf16>
    %78 = vector.broadcast %77 : vector<1x256xbf16> to vector<4x256xbf16>
    %79 = arith.mulf %76, %78 : vector<4x256xbf16>
    %c8 = arith.constant 8 : index
    %c0_68 = arith.constant 0 : index
    %c0_69 = arith.constant 0 : index
    %80 = vector.load %arg5[%c8, %c0_68, %c0_69] : memref<9x4x4xbf16, #tpu.memory_space<vmem>>, vector<1x4x4xbf16>
    %81 = vector.shape_cast %80 : vector<1x4x4xbf16> to vector<4x4xbf16>
    %cst_70 = arith.constant dense<0.000000e+00> : vector<4x256xf32>
    %82 = tpu.matmul %81, %79, %cst_70 {dimension_numbers = #tpu.dot_dimension_numbers<[1], [0], [0], [1], [0, 0, 1, 1], [], []>} : vector<4x4xbf16>, vector<4x256xbf16>, vector<4x256xf32> -> vector<4x256xf32>
    %83 = arith.addf %75, %82 : vector<4x256xf32>
    %c0_71 = arith.constant 0 : index
    %c4_72 = arith.constant 4 : index
    %c0_73 = arith.constant 0 : index
    %84 = vector.load %arg12[%c0_71, %c4_72, %c0_73] : memref<1x16x256xf32, #tpu.memory_space<vmem>>, vector<1x4x256xf32>
    %85 = vector.shape_cast %84 : vector<1x4x256xf32> to vector<4x256xf32>
    %86 = vector.shape_cast %83 : vector<4x256xf32> to vector<1x4x256xf32>
    tpu.vector_store %arg12[%c0_71, %c4_72, %c0_73], %86 {strides = array<i32>} : memref<1x16x256xf32, #tpu.memory_space<vmem>>, vector<1x4x256xf32>,
    %c0_74 = arith.constant 0 : index
    %c0_75 = arith.constant 0 : index
    %87 = vector.load %arg6[%c0_74, %c0_75] : memref<8x1xf32, #tpu.memory_space<vmem>>, vector<8x1xf32>
    %c0_76 = arith.constant 0 : index
    %c0_77 = arith.constant 0 : index
    %88 = vector.load %arg7[%c0_76, %c0_77] : memref<8x1xf32, #tpu.memory_space<vmem>>, vector<8x1xf32>
    %c0_78 = arith.constant 0 : index
    %c0_79 = arith.constant 0 : index
    %c0_80 = arith.constant 0 : index
    %89 = vector.load %arg12[%c0_78, %c0_79, %c0_80] : memref<1x16x256xf32, #tpu.memory_space<vmem>>, vector<1x8x256xf32>
    %90 = vector.shape_cast %89 : vector<1x8x256xf32> to vector<8x256xf32>
    %91 = vector.broadcast %87 : vector<8x1xf32> to vector<8x256xf32>
    %92 = arith.mulf %90, %91 : vector<8x256xf32>
    %93 = vector.broadcast %88 : vector<8x1xf32> to vector<8x256xf32>
    %94 = arith.addf %92, %93 : vector<8x256xf32>
    %cst_81 = arith.constant 0.000000e+00 : f32
    %95 = vector.broadcast %cst_81 : f32 to vector<8x256xf32>
    %96 = arith.maximumf %94, %95 : vector<8x256xf32>
    %97 = arith.truncf %96 : vector<8x256xf32> to vector<8x256xbf16>
    %c0_82 = arith.constant 0 : index
    %c17_83 = arith.constant 17 : index
    %98 = vector.load %arg13[%c0_82, %c17_83] : memref<12x290xbf16, #tpu.memory_space<vmem>>, vector<8x256xbf16>
    tpu.vector_store %arg13[%c0_82, %c17_83], %97 {strides = array<i32>} : memref<12x290xbf16, #tpu.memory_space<vmem>>, vector<8x256xbf16>,
    %cst_84 = arith.constant 0.000000e+00 : f32
    %99 = vector.broadcast %cst_84 : f32 to vector<4x256xf32>
    %c0_85 = arith.constant 0 : index
    %c0_86 = arith.constant 0 : index
    %100 = vector.load %arg13[%c0_85, %c0_86] : memref<12x290xbf16, #tpu.memory_space<vmem>>, vector<8x256xbf16>
    %c0_87 = arith.constant 0 : index
    %c0_88 = arith.constant 0 : index
    %101 = vector.load %arg2[%c0_87, %c0_88] : memref<2x256xbf16, #tpu.memory_space<vmem>>, vector<1x256xbf16>
    %102 = vector.broadcast %101 : vector<1x256xbf16> to vector<8x256xbf16>
    %103 = arith.mulf %100, %102 : vector<8x256xbf16>
    %c0_89 = arith.constant 0 : index
    %c0_90 = arith.constant 0 : index
    %c0_91 = arith.constant 0 : index
    %104 = vector.load %arg8[%c0_89, %c0_90, %c0_91] : memref<9x4x8xbf16, #tpu.memory_space<vmem>>, vector<1x4x8xbf16>
    %105 = vector.shape_cast %104 : vector<1x4x8xbf16> to vector<4x8xbf16>
    %cst_92 = arith.constant dense<0.000000e+00> : vector<4x256xf32>
    %106 = tpu.matmul %105, %103, %cst_92 {dimension_numbers = #tpu.dot_dimension_numbers<[1], [0], [0], [1], [0, 0, 1, 1], [], []>} : vector<4x8xbf16>, vector<8x256xbf16>, vector<4x256xf32> -> vector<4x256xf32>
    %107 = arith.addf %99, %106 : vector<4x256xf32>
    %c0_93 = arith.constant 0 : index
    %c1_94 = arith.constant 1 : index
    %108 = vector.load %arg13[%c0_93, %c1_94] : memref<12x290xbf16, #tpu.memory_space<vmem>>, vector<8x256xbf16>
    %c1_95 = arith.constant 1 : index
    %c0_96 = arith.constant 0 : index
    %c0_97 = arith.constant 0 : index
    %109 = vector.load %arg8[%c1_95, %c0_96, %c0_97] : memref<9x4x8xbf16, #tpu.memory_space<vmem>>, vector<1x4x8xbf16>
    %110 = vector.shape_cast %109 : vector<1x4x8xbf16> to vector<4x8xbf16>
    %cst_98 = arith.constant dense<0.000000e+00> : vector<4x256xf32>
    %111 = tpu.matmul %110, %108, %cst_98 {dimension_numbers = #tpu.dot_dimension_numbers<[1], [0], [0], [1], [0, 0, 1, 1], [], []>} : vector<4x8xbf16>, vector<8x256xbf16>, vector<4x256xf32> -> vector<4x256xf32>
    %112 = arith.addf %107, %111 : vector<4x256xf32>
    %c0_99 = arith.constant 0 : index
    %c2_100 = arith.constant 2 : index
    %113 = vector.load %arg13[%c0_99, %c2_100] : memref<12x290xbf16, #tpu.memory_space<vmem>>, vector<8x256xbf16>
    %c1_101 = arith.constant 1 : index
    %c0_102 = arith.constant 0 : index
    %114 = vector.load %arg2[%c1_101, %c0_102] : memref<2x256xbf16, #tpu.memory_space<vmem>>, vector<1x256xbf16>
    %115 = vector.broadcast %114 : vector<1x256xbf16> to vector<8x256xbf16>
    %116 = arith.mulf %113, %115 : vector<8x256xbf16>
    %c2_103 = arith.constant 2 : index
    %c0_104 = arith.constant 0 : index
    %c0_105 = arith.constant 0 : index
    %117 = vector.load %arg8[%c2_103, %c0_104, %c0_105] : memref<9x4x8xbf16, #tpu.memory_space<vmem>>, vector<1x4x8xbf16>
    %118 = vector.shape_cast %117 : vector<1x4x8xbf16> to vector<4x8xbf16>
    %cst_106 = arith.constant dense<0.000000e+00> : vector<4x256xf32>
    %119 = tpu.matmul %118, %116, %cst_106 {dimension_numbers = #tpu.dot_dimension_numbers<[1], [0], [0], [1], [0, 0, 1, 1], [], []>} : vector<4x8xbf16>, vector<8x256xbf16>, vector<4x256xf32> -> vector<4x256xf32>
    %120 = arith.addf %112, %119 : vector<4x256xf32>
    %c0_107 = arith.constant 0 : index
    %c16_108 = arith.constant 16 : index
    %121 = vector.load %arg13[%c0_107, %c16_108] : memref<12x290xbf16, #tpu.memory_space<vmem>>, vector<8x256xbf16>
    %c0_109 = arith.constant 0 : index
    %c0_110 = arith.constant 0 : index
    %122 = vector.load %arg2[%c0_109, %c0_110] : memref<2x256xbf16, #tpu.memory_space<vmem>>, vector<1x256xbf16>
    %123 = vector.broadcast %122 : vector<1x256xbf16> to vector<8x256xbf16>
    %124 = arith.mulf %121, %123 : vector<8x256xbf16>
    %c3_111 = arith.constant 3 : index
    %c0_112 = arith.constant 0 : index
    %c0_113 = arith.constant 0 : index
    %125 = vector.load %arg8[%c3_111, %c0_112, %c0_113] : memref<9x4x8xbf16, #tpu.memory_space<vmem>>, vector<1x4x8xbf16>
    %126 = vector.shape_cast %125 : vector<1x4x8xbf16> to vector<4x8xbf16>
    %cst_114 = arith.constant dense<0.000000e+00> : vector<4x256xf32>
    %127 = tpu.matmul %126, %124, %cst_114 {dimension_numbers = #tpu.dot_dimension_numbers<[1], [0], [0], [1], [0, 0, 1, 1], [], []>} : vector<4x8xbf16>, vector<8x256xbf16>, vector<4x256xf32> -> vector<4x256xf32>
    %128 = arith.addf %120, %127 : vector<4x256xf32>
    %c0_115 = arith.constant 0 : index
    %c17_116 = arith.constant 17 : index
    %129 = vector.load %arg13[%c0_115, %c17_116] : memref<12x290xbf16, #tpu.memory_space<vmem>>, vector<8x256xbf16>
    %c4_117 = arith.constant 4 : index
    %c0_118 = arith.constant 0 : index
    %c0_119 = arith.constant 0 : index
    %130 = vector.load %arg8[%c4_117, %c0_118, %c0_119] : memref<9x4x8xbf16, #tpu.memory_space<vmem>>, vector<1x4x8xbf16>
    %131 = vector.shape_cast %130 : vector<1x4x8xbf16> to vector<4x8xbf16>
    %cst_120 = arith.constant dense<0.000000e+00> : vector<4x256xf32>
    %132 = tpu.matmul %131, %129, %cst_120 {dimension_numbers = #tpu.dot_dimension_numbers<[1], [0], [0], [1], [0, 0, 1, 1], [], []>} : vector<4x8xbf16>, vector<8x256xbf16>, vector<4x256xf32> -> vector<4x256xf32>
    %133 = arith.addf %128, %132 : vector<4x256xf32>
    %c0_121 = arith.constant 0 : index
    %c18_122 = arith.constant 18 : index
    %134 = vector.load %arg13[%c0_121, %c18_122] : memref<12x290xbf16, #tpu.memory_space<vmem>>, vector<8x256xbf16>
    %c1_123 = arith.constant 1 : index
    %c0_124 = arith.constant 0 : index
    %135 = vector.load %arg2[%c1_123, %c0_124] : memref<2x256xbf16, #tpu.memory_space<vmem>>, vector<1x256xbf16>
    %136 = vector.broadcast %135 : vector<1x256xbf16> to vector<8x256xbf16>
    %137 = arith.mulf %134, %136 : vector<8x256xbf16>
    %c5_125 = arith.constant 5 : index
    %c0_126 = arith.constant 0 : index
    %c0_127 = arith.constant 0 : index
    %138 = vector.load %arg8[%c5_125, %c0_126, %c0_127] : memref<9x4x8xbf16, #tpu.memory_space<vmem>>, vector<1x4x8xbf16>
    %139 = vector.shape_cast %138 : vector<1x4x8xbf16> to vector<4x8xbf16>
    %cst_128 = arith.constant dense<0.000000e+00> : vector<4x256xf32>
    %140 = tpu.matmul %139, %137, %cst_128 {dimension_numbers = #tpu.dot_dimension_numbers<[1], [0], [0], [1], [0, 0, 1, 1], [], []>} : vector<4x8xbf16>, vector<8x256xbf16>, vector<4x256xf32> -> vector<4x256xf32>
    %141 = arith.addf %133, %140 : vector<4x256xf32>
    %c0_129 = arith.constant 0 : index
    %c32_130 = arith.constant 32 : index
    %142 = vector.load %arg13[%c0_129, %c32_130] : memref<12x290xbf16, #tpu.memory_space<vmem>>, vector<8x256xbf16>
    %c0_131 = arith.constant 0 : index
    %c0_132 = arith.constant 0 : index
    %143 = vector.load %arg2[%c0_131, %c0_132] : memref<2x256xbf16, #tpu.memory_space<vmem>>, vector<1x256xbf16>
    %144 = vector.broadcast %143 : vector<1x256xbf16> to vector<8x256xbf16>
    %145 = arith.mulf %142, %144 : vector<8x256xbf16>
    %c6_133 = arith.constant 6 : index
    %c0_134 = arith.constant 0 : index
    %c0_135 = arith.constant 0 : index
    %146 = vector.load %arg8[%c6_133, %c0_134, %c0_135] : memref<9x4x8xbf16, #tpu.memory_space<vmem>>, vector<1x4x8xbf16>
    %147 = vector.shape_cast %146 : vector<1x4x8xbf16> to vector<4x8xbf16>
    %cst_136 = arith.constant dense<0.000000e+00> : vector<4x256xf32>
    %148 = tpu.matmul %147, %145, %cst_136 {dimension_numbers = #tpu.dot_dimension_numbers<[1], [0], [0], [1], [0, 0, 1, 1], [], []>} : vector<4x8xbf16>, vector<8x256xbf16>, vector<4x256xf32> -> vector<4x256xf32>
    %149 = arith.addf %141, %148 : vector<4x256xf32>
    %c0_137 = arith.constant 0 : index
    %c33_138 = arith.constant 33 : index
    %150 = vector.load %arg13[%c0_137, %c33_138] : memref<12x290xbf16, #tpu.memory_space<vmem>>, vector<8x256xbf16>
    %c7_139 = arith.constant 7 : index
    %c0_140 = arith.constant 0 : index
    %c0_141 = arith.constant 0 : index
    %151 = vector.load %arg8[%c7_139, %c0_140, %c0_141] : memref<9x4x8xbf16, #tpu.memory_space<vmem>>, vector<1x4x8xbf16>
    %152 = vector.shape_cast %151 : vector<1x4x8xbf16> to vector<4x8xbf16>
    %cst_142 = arith.constant dense<0.000000e+00> : vector<4x256xf32>
    %153 = tpu.matmul %152, %150, %cst_142 {dimension_numbers = #tpu.dot_dimension_numbers<[1], [0], [0], [1], [0, 0, 1, 1], [], []>} : vector<4x8xbf16>, vector<8x256xbf16>, vector<4x256xf32> -> vector<4x256xf32>
    %154 = arith.addf %149, %153 : vector<4x256xf32>
    %c0_143 = arith.constant 0 : index
    %c34_144 = arith.constant 34 : index
    %155 = vector.load %arg13[%c0_143, %c34_144] : memref<12x290xbf16, #tpu.memory_space<vmem>>, vector<8x256xbf16>
    %c1_145 = arith.constant 1 : index
    %c0_146 = arith.constant 0 : index
    %156 = vector.load %arg2[%c1_145, %c0_146] : memref<2x256xbf16, #tpu.memory_space<vmem>>, vector<1x256xbf16>
    %157 = vector.broadcast %156 : vector<1x256xbf16> to vector<8x256xbf16>
    %158 = arith.mulf %155, %157 : vector<8x256xbf16>
    %c8_147 = arith.constant 8 : index
    %c0_148 = arith.constant 0 : index
    %c0_149 = arith.constant 0 : index
    %159 = vector.load %arg8[%c8_147, %c0_148, %c0_149] : memref<9x4x8xbf16, #tpu.memory_space<vmem>>, vector<1x4x8xbf16>
    %160 = vector.shape_cast %159 : vector<1x4x8xbf16> to vector<4x8xbf16>
    %cst_150 = arith.constant dense<0.000000e+00> : vector<4x256xf32>
    %161 = tpu.matmul %160, %158, %cst_150 {dimension_numbers = #tpu.dot_dimension_numbers<[1], [0], [0], [1], [0, 0, 1, 1], [], []>} : vector<4x8xbf16>, vector<8x256xbf16>, vector<4x256xf32> -> vector<4x256xf32>
    %162 = arith.addf %154, %161 : vector<4x256xf32>
    %c0_151 = arith.constant 0 : index
    %c8_152 = arith.constant 8 : index
    %c0_153 = arith.constant 0 : index
    %163 = vector.load %arg12[%c0_151, %c8_152, %c0_153] : memref<1x16x256xf32, #tpu.memory_space<vmem>>, vector<1x4x256xf32>
    %164 = vector.shape_cast %163 : vector<1x4x256xf32> to vector<4x256xf32>
    %165 = vector.shape_cast %162 : vector<4x256xf32> to vector<1x4x256xf32>
    tpu.vector_store %arg12[%c0_151, %c8_152, %c0_153], %165 {strides = array<i32>} : memref<1x16x256xf32, #tpu.memory_space<vmem>>, vector<1x4x256xf32>,
    %c0_154 = arith.constant 0 : index
    %c0_155 = arith.constant 0 : index
    %166 = vector.load %arg9[%c0_154, %c0_155] : memref<12x1xf32, #tpu.memory_space<vmem>>, vector<12x1xf32>
    %c0_156 = arith.constant 0 : index
    %c0_157 = arith.constant 0 : index
    %167 = vector.load %arg10[%c0_156, %c0_157] : memref<12x1xf32, #tpu.memory_space<vmem>>, vector<12x1xf32>
    %c0_158 = arith.constant 0 : index
    %c0_159 = arith.constant 0 : index
    %c0_160 = arith.constant 0 : index
    %168 = vector.load %arg12[%c0_158, %c0_159, %c0_160] : memref<1x16x256xf32, #tpu.memory_space<vmem>>, vector<1x12x256xf32>
    %169 = vector.shape_cast %168 : vector<1x12x256xf32> to vector<12x256xf32>
    %170 = vector.broadcast %166 : vector<12x1xf32> to vector<12x256xf32>
    %171 = arith.mulf %169, %170 : vector<12x256xf32>
    %172 = vector.broadcast %167 : vector<12x1xf32> to vector<12x256xf32>
    %173 = arith.addf %171, %172 : vector<12x256xf32>
    %cst_161 = arith.constant 0.000000e+00 : f32
    %174 = vector.broadcast %cst_161 : f32 to vector<12x256xf32>
    %175 = arith.maximumf %173, %174 : vector<12x256xf32>
    %176 = arith.truncf %175 : vector<12x256xf32> to vector<12x256xbf16>
    %c0_162 = arith.constant 0 : index
    %c17_163 = arith.constant 17 : index
    %177 = vector.load %arg13[%c0_162, %c17_163] : memref<12x290xbf16, #tpu.memory_space<vmem>>, vector<12x256xbf16>
    tpu.vector_store %arg13[%c0_162, %c17_163], %176 {strides = array<i32>} : memref<12x290xbf16, #tpu.memory_space<vmem>>, vector<12x256xbf16>,
    %cst_164 = arith.constant 0.000000e+00 : f32
    %178 = vector.broadcast %cst_164 : f32 to vector<4x256xf32>
    %c0_165 = arith.constant 0 : index
    %c0_166 = arith.constant 0 : index
    %179 = vector.load %arg13[%c0_165, %c0_166] : memref<12x290xbf16, #tpu.memory_space<vmem>>, vector<12x256xbf16>
    %c0_167 = arith.constant 0 : index
    %c0_168 = arith.constant 0 : index
    %180 = vector.load %arg2[%c0_167, %c0_168] : memref<2x256xbf16, #tpu.memory_space<vmem>>, vector<1x256xbf16>
    %181 = vector.broadcast %180 : vector<1x256xbf16> to vector<12x256xbf16>
    %182 = arith.mulf %179, %181 : vector<12x256xbf16>
    %c0_169 = arith.constant 0 : index
    %c0_170 = arith.constant 0 : index
    %c0_171 = arith.constant 0 : index
    %183 = vector.load %arg11[%c0_169, %c0_170, %c0_171] : memref<9x4x12xbf16, #tpu.memory_space<vmem>>, vector<1x4x12xbf16>
    %184 = vector.shape_cast %183 : vector<1x4x12xbf16> to vector<4x12xbf16>
    %cst_172 = arith.constant dense<0.000000e+00> : vector<4x256xf32>
    %185 = tpu.matmul %184, %182, %cst_172 {dimension_numbers = #tpu.dot_dimension_numbers<[1], [0], [0], [1], [0, 0, 1, 1], [], []>} : vector<4x12xbf16>, vector<12x256xbf16>, vector<4x256xf32> -> vector<4x256xf32>
    %186 = arith.addf %178, %185 : vector<4x256xf32>
    %c0_173 = arith.constant 0 : index
    %c1_174 = arith.constant 1 : index
    %187 = vector.load %arg13[%c0_173, %c1_174] : memref<12x290xbf16, #tpu.memory_space<vmem>>, vector<12x256xbf16>
    %c1_175 = arith.constant 1 : index
    %c0_176 = arith.constant 0 : index
    %c0_177 = arith.constant 0 : index
    %188 = vector.load %arg11[%c1_175, %c0_176, %c0_177] : memref<9x4x12xbf16, #tpu.memory_space<vmem>>, vector<1x4x12xbf16>
    %189 = vector.shape_cast %188 : vector<1x4x12xbf16> to vector<4x12xbf16>
    %cst_178 = arith.constant dense<0.000000e+00> : vector<4x256xf32>
    %190 = tpu.matmul %189, %187, %cst_178 {dimension_numbers = #tpu.dot_dimension_numbers<[1], [0], [0], [1], [0, 0, 1, 1], [], []>} : vector<4x12xbf16>, vector<12x256xbf16>, vector<4x256xf32> -> vector<4x256xf32>
    %191 = arith.addf %186, %190 : vector<4x256xf32>
    %c0_179 = arith.constant 0 : index
    %c2_180 = arith.constant 2 : index
    %192 = vector.load %arg13[%c0_179, %c2_180] : memref<12x290xbf16, #tpu.memory_space<vmem>>, vector<12x256xbf16>
    %c1_181 = arith.constant 1 : index
    %c0_182 = arith.constant 0 : index
    %193 = vector.load %arg2[%c1_181, %c0_182] : memref<2x256xbf16, #tpu.memory_space<vmem>>, vector<1x256xbf16>
    %194 = vector.broadcast %193 : vector<1x256xbf16> to vector<12x256xbf16>
    %195 = arith.mulf %192, %194 : vector<12x256xbf16>
    %c2_183 = arith.constant 2 : index
    %c0_184 = arith.constant 0 : index
    %c0_185 = arith.constant 0 : index
    %196 = vector.load %arg11[%c2_183, %c0_184, %c0_185] : memref<9x4x12xbf16, #tpu.memory_space<vmem>>, vector<1x4x12xbf16>
    %197 = vector.shape_cast %196 : vector<1x4x12xbf16> to vector<4x12xbf16>
    %cst_186 = arith.constant dense<0.000000e+00> : vector<4x256xf32>
    %198 = tpu.matmul %197, %195, %cst_186 {dimension_numbers = #tpu.dot_dimension_numbers<[1], [0], [0], [1], [0, 0, 1, 1], [], []>} : vector<4x12xbf16>, vector<12x256xbf16>, vector<4x256xf32> -> vector<4x256xf32>
    %199 = arith.addf %191, %198 : vector<4x256xf32>
    %c0_187 = arith.constant 0 : index
    %c16_188 = arith.constant 16 : index
    %200 = vector.load %arg13[%c0_187, %c16_188] : memref<12x290xbf16, #tpu.memory_space<vmem>>, vector<12x256xbf16>
    %c0_189 = arith.constant 0 : index
    %c0_190 = arith.constant 0 : index
    %201 = vector.load %arg2[%c0_189, %c0_190] : memref<2x256xbf16, #tpu.memory_space<vmem>>, vector<1x256xbf16>
    %202 = vector.broadcast %201 : vector<1x256xbf16> to vector<12x256xbf16>
    %203 = arith.mulf %200, %202 : vector<12x256xbf16>
    %c3_191 = arith.constant 3 : index
    %c0_192 = arith.constant 0 : index
    %c0_193 = arith.constant 0 : index
    %204 = vector.load %arg11[%c3_191, %c0_192, %c0_193] : memref<9x4x12xbf16, #tpu.memory_space<vmem>>, vector<1x4x12xbf16>
    %205 = vector.shape_cast %204 : vector<1x4x12xbf16> to vector<4x12xbf16>
    %cst_194 = arith.constant dense<0.000000e+00> : vector<4x256xf32>
    %206 = tpu.matmul %205, %203, %cst_194 {dimension_numbers = #tpu.dot_dimension_numbers<[1], [0], [0], [1], [0, 0, 1, 1], [], []>} : vector<4x12xbf16>, vector<12x256xbf16>, vector<4x256xf32> -> vector<4x256xf32>
    %207 = arith.addf %199, %206 : vector<4x256xf32>
    %c0_195 = arith.constant 0 : index
    %c17_196 = arith.constant 17 : index
    %208 = vector.load %arg13[%c0_195, %c17_196] : memref<12x290xbf16, #tpu.memory_space<vmem>>, vector<12x256xbf16>
    %c4_197 = arith.constant 4 : index
    %c0_198 = arith.constant 0 : index
    %c0_199 = arith.constant 0 : index
    %209 = vector.load %arg11[%c4_197, %c0_198, %c0_199] : memref<9x4x12xbf16, #tpu.memory_space<vmem>>, vector<1x4x12xbf16>
    %210 = vector.shape_cast %209 : vector<1x4x12xbf16> to vector<4x12xbf16>
    %cst_200 = arith.constant dense<0.000000e+00> : vector<4x256xf32>
    %211 = tpu.matmul %210, %208, %cst_200 {dimension_numbers = #tpu.dot_dimension_numbers<[1], [0], [0], [1], [0, 0, 1, 1], [], []>} : vector<4x12xbf16>, vector<12x256xbf16>, vector<4x256xf32> -> vector<4x256xf32>
    %212 = arith.addf %207, %211 : vector<4x256xf32>
    %c0_201 = arith.constant 0 : index
    %c18_202 = arith.constant 18 : index
    %213 = vector.load %arg13[%c0_201, %c18_202] : memref<12x290xbf16, #tpu.memory_space<vmem>>, vector<12x256xbf16>
    %c1_203 = arith.constant 1 : index
    %c0_204 = arith.constant 0 : index
    %214 = vector.load %arg2[%c1_203, %c0_204] : memref<2x256xbf16, #tpu.memory_space<vmem>>, vector<1x256xbf16>
    %215 = vector.broadcast %214 : vector<1x256xbf16> to vector<12x256xbf16>
    %216 = arith.mulf %213, %215 : vector<12x256xbf16>
    %c5_205 = arith.constant 5 : index
    %c0_206 = arith.constant 0 : index
    %c0_207 = arith.constant 0 : index
    %217 = vector.load %arg11[%c5_205, %c0_206, %c0_207] : memref<9x4x12xbf16, #tpu.memory_space<vmem>>, vector<1x4x12xbf16>
    %218 = vector.shape_cast %217 : vector<1x4x12xbf16> to vector<4x12xbf16>
    %cst_208 = arith.constant dense<0.000000e+00> : vector<4x256xf32>
    %219 = tpu.matmul %218, %216, %cst_208 {dimension_numbers = #tpu.dot_dimension_numbers<[1], [0], [0], [1], [0, 0, 1, 1], [], []>} : vector<4x12xbf16>, vector<12x256xbf16>, vector<4x256xf32> -> vector<4x256xf32>
    %220 = arith.addf %212, %219 : vector<4x256xf32>
    %c0_209 = arith.constant 0 : index
    %c32_210 = arith.constant 32 : index
    %221 = vector.load %arg13[%c0_209, %c32_210] : memref<12x290xbf16, #tpu.memory_space<vmem>>, vector<12x256xbf16>
    %c0_211 = arith.constant 0 : index
    %c0_212 = arith.constant 0 : index
    %222 = vector.load %arg2[%c0_211, %c0_212] : memref<2x256xbf16, #tpu.memory_space<vmem>>, vector<1x256xbf16>
    %223 = vector.broadcast %222 : vector<1x256xbf16> to vector<12x256xbf16>
    %224 = arith.mulf %221, %223 : vector<12x256xbf16>
    %c6_213 = arith.constant 6 : index
    %c0_214 = arith.constant 0 : index
    %c0_215 = arith.constant 0 : index
    %225 = vector.load %arg11[%c6_213, %c0_214, %c0_215] : memref<9x4x12xbf16, #tpu.memory_space<vmem>>, vector<1x4x12xbf16>
    %226 = vector.shape_cast %225 : vector<1x4x12xbf16> to vector<4x12xbf16>
    %cst_216 = arith.constant dense<0.000000e+00> : vector<4x256xf32>
    %227 = tpu.matmul %226, %224, %cst_216 {dimension_numbers = #tpu.dot_dimension_numbers<[1], [0], [0], [1], [0, 0, 1, 1], [], []>} : vector<4x12xbf16>, vector<12x256xbf16>, vector<4x256xf32> -> vector<4x256xf32>
    %228 = arith.addf %220, %227 : vector<4x256xf32>
    %c0_217 = arith.constant 0 : index
    %c33_218 = arith.constant 33 : index
    %229 = vector.load %arg13[%c0_217, %c33_218] : memref<12x290xbf16, #tpu.memory_space<vmem>>, vector<12x256xbf16>
    %c7_219 = arith.constant 7 : index
    %c0_220 = arith.constant 0 : index
    %c0_221 = arith.constant 0 : index
    %230 = vector.load %arg11[%c7_219, %c0_220, %c0_221] : memref<9x4x12xbf16, #tpu.memory_space<vmem>>, vector<1x4x12xbf16>
    %231 = vector.shape_cast %230 : vector<1x4x12xbf16> to vector<4x12xbf16>
    %cst_222 = arith.constant dense<0.000000e+00> : vector<4x256xf32>
    %232 = tpu.matmul %231, %229, %cst_222 {dimension_numbers = #tpu.dot_dimension_numbers<[1], [0], [0], [1], [0, 0, 1, 1], [], []>} : vector<4x12xbf16>, vector<12x256xbf16>, vector<4x256xf32> -> vector<4x256xf32>
    %233 = arith.addf %228, %232 : vector<4x256xf32>
    %c0_223 = arith.constant 0 : index
    %c34_224 = arith.constant 34 : index
    %234 = vector.load %arg13[%c0_223, %c34_224] : memref<12x290xbf16, #tpu.memory_space<vmem>>, vector<12x256xbf16>
    %c1_225 = arith.constant 1 : index
    %c0_226 = arith.constant 0 : index
    %235 = vector.load %arg2[%c1_225, %c0_226] : memref<2x256xbf16, #tpu.memory_space<vmem>>, vector<1x256xbf16>
    %236 = vector.broadcast %235 : vector<1x256xbf16> to vector<12x256xbf16>
    %237 = arith.mulf %234, %236 : vector<12x256xbf16>
    %c8_227 = arith.constant 8 : index
    %c0_228 = arith.constant 0 : index
    %c0_229 = arith.constant 0 : index
    %238 = vector.load %arg11[%c8_227, %c0_228, %c0_229] : memref<9x4x12xbf16, #tpu.memory_space<vmem>>, vector<1x4x12xbf16>
    %239 = vector.shape_cast %238 : vector<1x4x12xbf16> to vector<4x12xbf16>
    %cst_230 = arith.constant dense<0.000000e+00> : vector<4x256xf32>
    %240 = tpu.matmul %239, %237, %cst_230 {dimension_numbers = #tpu.dot_dimension_numbers<[1], [0], [0], [1], [0, 0, 1, 1], [], []>} : vector<4x12xbf16>, vector<12x256xbf16>, vector<4x256xf32> -> vector<4x256xf32>
    %241 = arith.addf %233, %240 : vector<4x256xf32>
    %c0_231 = arith.constant 0 : index
    %c12 = arith.constant 12 : index
    %c0_232 = arith.constant 0 : index
    %242 = vector.load %arg12[%c0_231, %c12, %c0_232] : memref<1x16x256xf32, #tpu.memory_space<vmem>>, vector<1x4x256xf32>
    %243 = vector.shape_cast %242 : vector<1x4x256xf32> to vector<4x256xf32>
    %244 = vector.shape_cast %241 : vector<4x256xf32> to vector<1x4x256xf32>
    tpu.vector_store %arg12[%c0_231, %c12, %c0_232], %244 {strides = array<i32>} : memref<1x16x256xf32, #tpu.memory_space<vmem>>, vector<1x4x256xf32>,
    return
  }
  func.func @transform_0(%arg0: i32) -> (i32, i32, i32) {
    %c0_i32 = arith.constant 0 : i32
    %c0_i32_0 = arith.constant 0 : i32
    %c0_i32_1 = arith.constant 0 : i32
    return %arg0, %c0_i32, %c0_i32_0 : i32, i32, i32
  }
  func.func @transform_1(%arg0: i32) -> (i32, i32) {
    %c0_i32 = arith.constant 0 : i32
    %c0_i32_0 = arith.constant 0 : i32
    %c0_i32_1 = arith.constant 0 : i32
    return %c0_i32, %c0_i32_0 : i32, i32
  }
  func.func @transform_2(%arg0: i32) -> (i32, i32) {
    %c0_i32 = arith.constant 0 : i32
    %c0_i32_0 = arith.constant 0 : i32
    %c0_i32_1 = arith.constant 0 : i32
    return %c0_i32, %c0_i32_0 : i32, i32
  }
  func.func @transform_3(%arg0: i32) -> (i32, i32) {
    %c0_i32 = arith.constant 0 : i32
    %c0_i32_0 = arith.constant 0 : i32
    %c0_i32_1 = arith.constant 0 : i32
    return %c0_i32, %c0_i32_0 : i32, i32
  }
  func.func @transform_4(%arg0: i32) -> (i32, i32, i32) {
    %c0_i32 = arith.constant 0 : i32
    %c0_i32_0 = arith.constant 0 : i32
    %c0_i32_1 = arith.constant 0 : i32
    %c0_i32_2 = arith.constant 0 : i32
    return %c0_i32, %c0_i32_0, %c0_i32_1 : i32, i32, i32
  }
  func.func @transform_5(%arg0: i32) -> (i32, i32) {
    %c0_i32 = arith.constant 0 : i32
    %c0_i32_0 = arith.constant 0 : i32
    %c0_i32_1 = arith.constant 0 : i32
    return %c0_i32, %c0_i32_0 : i32, i32
  }
  func.func @transform_6(%arg0: i32) -> (i32, i32) {
    %c0_i32 = arith.constant 0 : i32
    %c0_i32_0 = arith.constant 0 : i32
    %c0_i32_1 = arith.constant 0 : i32
    return %c0_i32, %c0_i32_0 : i32, i32
  }
  func.func @transform_7(%arg0: i32) -> (i32, i32, i32) {
    %c0_i32 = arith.constant 0 : i32
    %c0_i32_0 = arith.constant 0 : i32
    %c0_i32_1 = arith.constant 0 : i32
    %c0_i32_2 = arith.constant 0 : i32
    return %c0_i32, %c0_i32_0, %c0_i32_1 : i32, i32, i32
  }
  func.func @transform_8(%arg0: i32) -> (i32, i32) {
    %c0_i32 = arith.constant 0 : i32
    %c0_i32_0 = arith.constant 0 : i32
    %c0_i32_1 = arith.constant 0 : i32
    return %c0_i32, %c0_i32_0 : i32, i32
  }
  func.func @transform_9(%arg0: i32) -> (i32, i32) {
    %c0_i32 = arith.constant 0 : i32
    %c0_i32_0 = arith.constant 0 : i32
    %c0_i32_1 = arith.constant 0 : i32
    return %c0_i32, %c0_i32_0 : i32, i32
  }
  func.func @transform_10(%arg0: i32) -> (i32, i32, i32) {
    %c0_i32 = arith.constant 0 : i32
    %c0_i32_0 = arith.constant 0 : i32
    %c0_i32_1 = arith.constant 0 : i32
    %c0_i32_2 = arith.constant 0 : i32
    return %c0_i32, %c0_i32_0, %c0_i32_1 : i32, i32, i32
  }
  func.func @transform_11(%arg0: i32) -> (i32, i32, i32) {
    %c0_i32 = arith.constant 0 : i32
    %c0_i32_0 = arith.constant 0 : i32
    %c0_i32_1 = arith.constant 0 : i32
    return %arg0, %c0_i32, %c0_i32_0 : i32, i32, i32
  }
}

</mosaic_0001>

<bundles_post_ra>
// kernel: dense_block_forward.1
= control target key start
LH: loop header
LB: loop body
LE: loop exit
PB: predicated region body
PF: predicated region fallthrough
CT: control target
= control target key end

     0   :  { %s3307_s17 = smov 0   ;;  %s3882_s0 = inlined_call_operand.vmem [shape: f32[2,4,256], index: 0, kind: input, shape index: {}]   ;;  %s3883_s1 = inlined_call_operand.vmem [shape: bf16[2,256], index: 1, kind: input, shape index: {}]   ;;  %s3884_s2 = inlined_call_operand.vmem [shape: f32[4,1], index: 2, kind: input, shape index: {}]   ;;  %s3885_s3 = inlined_call_operand.vmem [shape: f32[4,1], index: 3, kind: input, shape index: {}]   ;;  %s3886_s4 = inlined_call_operand.vmem [shape: bf16[9,4,4], index: 4, kind: input, shape index: {}]   ;;  %s3887_s5 = inlined_call_operand.vmem [shape: f32[8,1], index: 5, kind: input, shape index: {}]   ;;  %s3888_s6 = inlined_call_operand.vmem [shape: f32[8,1], index: 6, kind: input, shape index: {}]   ;;  %s3889_s7 = inlined_call_operand.vmem [shape: bf16[9,4,8], index: 7, kind: input, shape index: {}]   ;;  %s3890_s8 = inlined_call_operand.vmem [shape: f32[12,1], index: 8, kind: input, shape index: {}]   ;;  %s3891_s9 = inlined_call_operand.vmem [shape: f32[12,1], index: 9, kind: input, shape index: {}]   ;;  %s3892_s10 = inlined_call_operand.vmem [shape: bf16[9,4,12], index: 10, kind: input, shape index: {}]   ;;  %s3893_s11 = inlined_call_operand.vmem [shape: f32[2,16,256], index: 11, kind: output, shape index: {}]  }
   0x1 LB: > { %s2910_s18 = sadd.s32 4294967295, %s3229_s17   ;;  %p2914_p0 = scmp.ge.s32.totalorder %s3229_s17, 1  ;;  %s3229_s17 = sphi %s3307_s17, %s21_s17  }
   0x2   : > { %p337_p1 = scmp.lt.s32.totalorder %s3229_s17, 3 }
   0x4   : > { %p338_p2 = pnand %p2914_p0, %p337_p1 }
   0x5   : > { %v402_v0 = vld [vmem:[%s3884_s2] sm:$0xf] (!%p338_p2)  ;;  %p377_p3 = scmp.lt.s32.totalorder (!%p338_p2), %s2910_s18, 1  ;;  %v455_v1 = vlaneseq (!%p338_p2)  ;;  %v3231_v2 = vmov (!%p338_p2), 0   ;;  %v3232_v3 = vmov (!%p338_p2), 1966171168  }
   0x6   : > { %341 = sbr.rel (%p338_p2) target bundleno = 1926 (0x786), region = 64  ;;  %3208 = vset.pattern.permute.xlu0 (!%p338_p2), %v3231_v2  ;;  %882 = vmatprep.mubr.bf16.mxu0 (!%p338_p2), %v3231_v2  ;;  %v453_v4 = vunpack.c.l.s4 (!%p338_p2), %v3232_v3  ;;  %v403_v6 = vld [vmem:[%s3885_s3] sm:$0xf] (!%p338_p2)  ;;  %s3233_s14 = smov (!%p338_p2), 32   ;;  %vm388_vm0 = vcmask (!%p338_p2), 134144   ;;  %vm3896_vm1 = vcmask (!%p338_p2), 132096  }
   0x7   : > { %408 = vperm.xlu0 (!%p338_p2), %3208, %v402_v0   ;;  %v456_v5 = vshrl.u32 (!%p338_p2), %v455_v1, 7  ;;  %551 = vmatprep.mubr.bf16.mxu1 (!%p338_p2), %v3231_v2  ;;  %v2920_v7 = vld.sshfl [vmem:[%s3883_s1] sm:$0x11 pattern:$0x75316420] (!%p338_p2)  ;;  %s3234_s15 = smov (!%p338_p2), 16  }
   0x8   : > { %3209 = vset.pattern.permute.xlu1 (!%p338_p2), %v3231_v2  ;;  %v451_v8 = vcombine.high (!%p338_p2), %v2920_v7, %v2920_v7  ;;  %v454_v9 = vunpack.c.0.s8 (!%p338_p2), %v453_v4  ;;  %vm392_vm2 = vcmask (!%p338_p2), 273544   ;;  %389 = vst.msk [vmem:[#allocation2] sm:$0xf] (!%p338_p2), %vm388_vm0, %v3231_v2  ;;  %s3235_s16 = smov (!%p338_p2), 17   ;;  %s3237_s19 = smov (!%p338_p2), 2   ;;  %vm436_vm3 = vcmask (!%p338_p2), 1041544  }
   0x9   : > { %v3342_v16 = vsub.s32 (!%p338_p2), 0, %v456_v5  ;;  %393 = vst.msk [vmem:[#allocation2 + $0x8] sm:$0xf] (!%p338_p2), %vm392_vm2, %v3231_v2  ;;  %s3238_s20 = smov (!%p338_p2), 34   ;;  %vm437_vm4 = vcmask (!%p338_p2), 1045508   ;;  %vm432_vm5 = vcmask (!%p338_p2), 138240  }
   0xa   : > { %v3336_v11 = vsub.s32 (!%p338_p2), %v454_v9, %v456_v5  ;;  %391 = vst.msk [vmem:[#allocation2 + $0xc] sm:$0x3] (!%p338_p2), %vm3896_vm1, %v3231_v2  ;;  %vm3370_vm6 = vmor (!%p338_p2), %vm437_vm4, %vm436_vm3  ;;  %vm896_vm7 = vcmask (!%p338_p2), 146432   ;;  %s3904_s21 = smov (!%p338_p2), 111   ;;  %s3240_s22 = smov (!%p338_p2), 127   ;;  %vm976_vm8 = vcmask (!%p338_p2), 261120  }
   0xb   : > { %415 = vperm.xlu0 (!%p338_p2), %3208, %v403_v6   ;;  %s3902_s23 = smov (!%p338_p2), 110   ;;  %s3900_s24 = smov (!%p338_p2), 96   ;;  %vm663_vm9 = vcmask (!%p338_p2), 15360   ;;  %vm745_vm10 = vcmask (!%p338_p2), 130048   ;;  %vm3913_vm11 = vcmask (!%p338_p2), 277504   ;;  %vm3911_vm12 = vcmask (!%p338_p2), 908288  }
   0xc   : > { %v458_v13 = vrot.slane (!%p338_p2), %v2920_v7, %v3336_v11  ;;  %v465_v14 = vrot.slane (!%p338_p2), %v451_v8, %v3336_v11  ;;  %s3906_s27 = smov (!%p338_p2), 112   ;;  %s3908_s28 = smov (!%p338_p2), 94   ;;  %vm512_vm13 = vcmask (!%p338_p2), 1041408   ;;  %vm505_vm14 = vcmask (!%p338_p2), 1039360  }
   0xd   : > { %s3944_s18 = smov (!%p377_p3, %s2910_s18), 1  ;;  %vm508_vm15 = vcmask 31744   ;;  %vm3910_vm2 = vcmask 900096   ;;  %vm3897_vm3 = vcmask 785408   ;;  %vm3898_vm4 = vcmask 777216   ;;  %s3932_s12 = smov 94  }
   0xe   : > { %s3084_s25 = sshll.u32 %s3944_s18, 3  ;;  %s3085_s26 = sshll.u32 %s3944_s18, 5  ;;  %v467_v15 = vpack.i.b16 %v458_v13, %v458_v13  ;;  %v474_v17 = vpack.i.b16 %v465_v14, %v465_v14  ;;  %v640_v21 = vshrl.u32 %v458_v13, 16  ;;  %v648_v22 = vshrl.u32 %v465_v14, 16 }
   0xf   : > { %s381_s29 = scalar_lea.vmem %s3882_s0, %s3084_s25  ;;  %s3334_s13 = scalar_lea.vmem %s3893_s11, %s3085_s26 }
  0x10   : > { %v396_v10 = vld [vmem:[%s381_s29] sm:$0xff]  ;;  %v472_v18 = vrot.slane %v467_v15, %v3342_v16  ;;  %v479_v19 = vrot.slane %v474_v17, %v3342_v16  ;;  %v641_v28 = vpack.i.b16 %v640_v21, %v640_v21  ;;  %v649_v29 = vpack.i.b16 %v648_v22, %v648_v22  ;;  %s3236_s18 = smov 18   ;;  %s3243_s25 = smov 126  }
  0x11   : > { %v398_v12 = vcombine.high %v396_v10, %v396_v10  ;;  %400 = vst [vmem:[%s3334_s13] sm:$0xf] %v396_v10  ;;  %s3894_s26 = smov 95  }
  0x12   : > { %v3346_v20 = vcombine.low %v472_v18, %v479_v19  ;;  %v646_v35 = vrot.slane %v641_v28, %v3342_v16  ;;  %v654_v36 = vrot.slane %v649_v29, %v3342_v16 }
  0x13   : > { %401 = vst [vmem:[%s3334_s13 + $0x8] sm:$0xf] %v398_v12 }
  0x14   : > { %973 = vrot.lane.b32.xlu0 %v3346_v20, %s3233_s14  ;;  %v3362_v38 = vcombine.low %v646_v35, %v654_v36 }
  0x18   : > { %742 = vrot.lane.b32.xlu0 %v3346_v20, %s3234_s15  ;;  %v404_v24 = vld [vmem:[%s3334_s13] sm:$0xf] }
  0x1a   : > { %v405_v25 = vld [vmem:[%s3334_s13 + $0x8] sm:$0xf] }
  0x86   : > { %v409_v23 = vpop.permute.xlu0 %408 }
  0x87   : > { %v411_v26 = vmul.f32 %v409_v23, %v404_v24  ;;  %v412_v27 = vmul.f32 %v409_v23, %v405_v25 }
  0x8a   : > { %v416_v30 = vpop.permute.xlu0 %415 }
  0x8b   : > { %v418_v31 = vadd.f32 %v416_v30, %v411_v26  ;;  %v419_v32 = vadd.f32 %v416_v30, %v412_v27 }
  0x8d   : > { %v420_v33 = vmax.f32 %v418_v31, 0.0  ;;  %v421_v34 = vmax.f32 %v419_v32, 0.0 }
  0x8e   : > { %v974_v54 = vpop.permute.xlu0 %973 }
  0x8f   : > { %v3086_v37 = vpack.c.bf16 %v421_v34, %v420_v33  ;;  %v975_v55 = vrot.slane %v974_v54, 4  ;;  %v1204_v33 = vld [vmem:[%s3887_s5] sm:$0xff] }
  0x90   : > { %v1205_v34 = vld [vmem:[%s3888_s6] sm:$0xff] }
  0x91   : > { %429 = vrot.lane.b32.xlu1 %v3086_v37, %s3235_s16  ;;  %v977_v63 = vsel %vm976_vm8, %v975_v55, %v974_v54 }
  0x92   : > { %v743_v9 = vpop.permute.xlu0 %742 }
  0x93   : > { %v744_v12 = vrot.slane %v743_v9, 4 }
  0x95   : > { %893 = vrot.lane.b32.xlu1 %v3362_v38, %s3236_s18  ;;  %v746_v17 = vsel %vm745_vm10, %v744_v12, %v743_v9 }
  0x99   : > { %660 = vrot.lane.b32.xlu1 %v3362_v38, %s3237_s19 }
  0x9d   : > { %1116 = vrot.lane.b32.xlu1 %v3362_v38, %s3238_s20 }
 0x103   : > { %v430_v39 = vpop.permute.xlu1 %429 }
 0x104   : > { %v431_v41 = vrot.slane %v430_v39, 4 }
 0x106   : > { %v433_v42 = vsel %vm432_vm5, %v431_v41, %v430_v39  ;;  %440 = vst.msk [vmem:[#allocation2 + $0x8] sm:$0x3] %vm3896_vm1, %v431_v41  ;;  %vm685_vm1 = vcmask 1031168  }
 0x107   : > { %439 = vst.msk [vmem:[#allocation2] sm:$0x33] %vm3370_vm6, %v433_v42  ;;  %v894_v45 = vpop.permute.xlu1 %893 }
 0x108   : > { %v895_v48 = vrot.slane %v894_v45, 4 }
 0x10a   : > { %v897_v52 = vsel %vm896_vm7, %v895_v48, %v894_v45  ;;  %v2946_v45 = vld [vmem:[%s3886_s4 + $0x8] sm:$0x3] }
 0x10b   : > { %v661_v0 = vpop.permute.xlu1 %660 }
 0x10c   : > { %v662_v3 = vrot.slane %v661_v0, 4 }
 0x10d   : > { %v3378_v43 = vld [vmem:[#allocation2 + $0x8] sm:$0x3] }
 0x10e   : > { %v3380_v44 = vld [vmem:[#allocation2] sm:$0x33]  ;;  %v2949_v46 = vcombine.low %v3378_v43, %v3378_v43  ;;  %v488_v49 = vld [vmem:[#allocation2 + $0x8] sm:$0x3]  ;;  %v981_v59 = vmul.bf16 %v975_v55, %v3378_v43  ;;  %v901_v60 = vmul.bf16 %v895_v48, %v3378_v43  ;;  %v664_v13 = vsel %vm663_vm9, %v662_v3, %v661_v0 }
 0x10f   : > { %v2948_v47 = vcombine.high %v3380_v44, %v3380_v44  ;;  %v2947_v50 = vcombine.low %v3380_v44, %v3380_v44  ;;  %v2925_v51 = vcombine.low %v488_v49, %v488_v49  ;;  %v3391_v53 = vld [vmem:[#allocation2] sm:$0x33]  ;;  %v900_v56 = vmul.bf16 %v897_v52, %v3380_v44  ;;  %v1117_v14 = vpop.permute.xlu1 %1116 }
 0x110   : > { %836 = vrot.lane.b32.xlu0 %v2949_v46, %s3904_s21  ;;  %v2924_v57 = vcombine.high %v3391_v53, %v3391_v53  ;;  %v2923_v58 = vcombine.low %v3391_v53, %v3391_v53  ;;  %v980_v1 = vmul.bf16 %v977_v63, %v3380_v44  ;;  %v2955_v4 = vcombine.low %v901_v60, %v901_v60 }
 0x111   : > { %834 = vrot.lane.b32.xlu1 %v2948_v47, %s3904_s21  ;;  %v2953_v61 = vcombine.low %v900_v56, %v900_v56  ;;  %v2954_v62 = vcombine.high %v900_v56, %v900_v56  ;;  %v2961_v5 = vcombine.low %v981_v59, %v981_v59  ;;  %v668_v6 = vmul.bf16 %v662_v3, %v488_v49 }
 0x112   : > { %v2960_v7 = vcombine.high %v980_v1, %v980_v1  ;;  %v2959_v8 = vcombine.low %v980_v1, %v980_v1  ;;  %v667_v15 = vmul.bf16 %v664_v13, %v3391_v53  ;;  %v1118_v18 = vrot.slane %v1117_v14, 4  ;;  %v2958_v13 = vld [vmem:[%s3886_s4 + $0xc] sm:$0x3] }
 0x113   : > { %v2937_v10 = vcombine.low %v668_v6, %v668_v6  ;;  %v749_v19 = vmul.bf16 %v746_v17, %v3380_v44  ;;  %v750_v21 = vmul.bf16 %v744_v12, %v3378_v43 }
 0x114   : > { %832 = vrot.lane.b32.xlu0 %v2947_v50, %s3904_s21  ;;  %v2935_v22 = vcombine.low %v667_v15, %v667_v15  ;;  %v2936_v23 = vcombine.high %v667_v15, %v667_v15  ;;  %v1120_v24 = vsel %vm3913_vm11, %v1118_v18, %v1117_v14  ;;  %v1124_v28 = vmul.bf16 %v1118_v18, %v3378_v43 }
 0x115   : > { %503 = vrot.lane.b32.xlu1 %v2925_v51, %s3240_s22  ;;  %v1123_v25 = vmul.bf16 %v1120_v24, %v3380_v44  ;;  %v2943_v26 = vcombine.low %v750_v21, %v750_v21  ;;  %v2942_v27 = vcombine.high %v749_v19, %v749_v19  ;;  %v2941_v29 = vcombine.low %v749_v19, %v749_v19 }
 0x116   : > { %v2970_v32 = vcombine.low %v1124_v28, %v1124_v28  ;;  %v486_v44 = vmul.bf16 %v3346_v20, %v3391_v53  ;;  %v2922_v53 = vld [vmem:[%s3886_s4 + $0x2] sm:$0x3] }
 0x117   : > { %v2968_v30 = vcombine.low %v1123_v25, %v1123_v25  ;;  %v2969_v31 = vcombine.high %v1123_v25, %v1123_v25 }
 0x118   : > { %501 = vrot.lane.b32.xlu0 %v2924_v57, %s3240_s22  ;;  %v2929_v51 = vcombine.high %v486_v44, %v486_v44  ;;  %v2928_v52 = vcombine.low %v486_v44, %v486_v44 }
 0x119   : > { %499 = vrot.lane.b32.xlu1 %v2923_v58, %s3240_s22 }
 0x11a   : > { %v569_v56 = vsel %vm512_vm13, %v2928_v52, 0 }
 0x11c   : > { %912 = vrot.lane.b32.xlu0 %v2953_v61, %s3902_s23 }
 0x11d   : > { %914 = vrot.lane.b32.xlu1 %v2954_v62, %s3902_s23  ;;  %v2952_v62 = vld [vmem:[%s3886_s4 + $0xa] sm:$0x3] }
 0x120   : > { %916 = vrot.lane.b32.xlu0 %v2955_v4, %s3902_s23 }
 0x121   : > { %996 = vrot.lane.b32.xlu1 %v2961_v5, %s3900_s24  ;;  %v487_v5 = vld [vmem:[%s3886_s4] sm:$0x3] }
 0x124   : > { %994 = vrot.lane.b32.xlu0 %v2960_v7, %s3900_s24 }
 0x125   : > { %992 = vrot.lane.b32.xlu1 %v2959_v8, %s3900_s24 }
 0x128   : > { %683 = vrot.lane.b32.xlu0 %v2937_v10, %s3243_s25 }
 0x129   : > { %1055 = vrot.lane.b32.xlu1 %v2947_v50, %s3894_s26 }
 0x12c   : > { %1057 = vrot.lane.b32.xlu0 %v2948_v47, %s3894_s26 }
 0x12d   : > { %1059 = vrot.lane.b32.xlu1 %v2949_v46, %s3894_s26  ;;  %s3918_s26 = smov 95  }
 0x130   : > { %679 = vrot.lane.b32.xlu0 %v2935_v22, %s3243_s25  ;;  %v2934_v22 = vld [vmem:[%s3886_s4 + $0x4] sm:$0x3] }
 0x131   : > { %681 = vrot.lane.b32.xlu1 %v2936_v23, %s3243_s25 }
 0x134   : > { %765 = vrot.lane.b32.xlu0 %v2943_v26, %s3906_s27 }
 0x135   : > { %763 = vrot.lane.b32.xlu1 %v2942_v27, %s3906_s27 }
 0x138   : > { %761 = vrot.lane.b32.xlu0 %v2941_v29, %s3906_s27 }
 0x139   : > { %1135 = vrot.lane.b32.xlu1 %v2968_v30, %s3908_s28  ;;  %v2964_v30 = vld [vmem:[%s3886_s4 + $0xe] sm:$0x3] }
 0x13c   : > { %1137 = vrot.lane.b32.xlu0 %v2969_v31, %s3908_s28 }
 0x13d   : > { %1139 = vrot.lane.b32.xlu1 %v2970_v32, %s3908_s28 }
 0x140   : > { %1210 = vperm.xlu0 %3208, %v1204_v33  }
 0x141   : > { %1217 = vperm.xlu1 %3209, %v1205_v34  }
 0x145   : > { %1460 = vrot.lane.b32.xlu1 %v3362_v38, %s3237_s19 }
 0x149   : > { %1688 = vrot.lane.b32.xlu1 %v3362_v38, %s3236_s18 }
 0x182   : > { %v837_v35 = vpop.permute.xlu0 %836 }
 0x183   : > { %v835_v36 = vpop.permute.xlu1 %834 }
 0x184   : > { %v840_v37 = vsel %vm3911_vm12, %v835_v36, %v837_v35 }
 0x185   : > { %2950 = vmatprep.subr.msk.bf16.mxu0 %vm512_vm13, %v840_v37  ;;  %v2967_v37 = vld [vmem:[%s3886_s4 + $0x10] sm:$0x3] }
 0x186   : > { %v833_v39 = vpop.permute.xlu0 %832 }
 0x187   : > { %v504_v41 = vpop.permute.xlu1 %503  ;;  %v839_v42 = vsel %vm3911_vm12, %v833_v39, %v835_v36  ;;  %v2940_v36 = vld [vmem:[%s3886_s4 + $0x6] sm:$0x3] }
 0x188   : > { %v845_v43 = vsel %vm512_vm13, %v839_v42, 0 }
 0x189   : > { %851 = vmatpush1.bf16.msra.mxu0 %v845_v43 }
 0x18a   : > { %v502_v46 = vpop.permute.xlu0 %501 }
 0x18b   : > { %v500_v47 = vpop.permute.xlu1 %499  ;;  %v507_v48 = vsel %vm505_vm14, %v502_v46, %v504_v41 }
 0x18c   : > { %v506_v49 = vsel %vm505_vm14, %v500_v47, %v502_v46  ;;  %2926 = vmatprep.subr.msk.bf16.mxu1 %vm512_vm13, %v507_v48  ;;  %2951 = vmatmul.mubr.msk.bf16.vlgmr.msra.gmra.mrb[0].mxu0 %vm508_vm15, %v2946_v45 }
 0x18d   : > { %v514_v50 = vsel %vm512_vm13, %v506_v49, 0  ;;  %962 = vmatprep.mubr.bf16.mxu0 %v3231_v2 }
 0x18e   : > { %520 = vmatpush1.bf16.msra.mxu1 %v514_v50  ;;  %v913_v54 = vpop.permute.xlu0 %912 }
 0x18f   : > { %2930 = vmatprep.subr.msk.bf16.mxu1 %vm512_vm13, %v2929_v51  ;;  %v915_v55 = vpop.permute.xlu1 %914 }
 0x190   : > { %v919_v57 = vsel %vm3910_vm2, %v913_v54, %v915_v55 }
 0x191   : > { %2927 = vmatmul.mubr.msk.bf16.vlgmr.msra.gmra.mrb[0].mxu1 %vm508_vm15, %v2922_v53  ;;  %v925_v61 = vsel %vm512_vm13, %v919_v57, 0 }
 0x192   : > { %575 = vmatpush1.bf16.msra.mxu1 %v569_v56  ;;  %606 = vmatprep.mubr.bf16.mxu1 %v3231_v2  ;;  %v917_v58 = vpop.permute.xlu0 %916 }
 0x193   : > { %v997_v59 = vpop.permute.xlu1 %996  ;;  %v920_v60 = vsel %vm3910_vm2, %v915_v55, %v917_v58 }
 0x194   : > { %2956 = vmatprep.subr.msk.bf16.mxu0 %vm512_vm13, %v920_v60 }
 0x195   : > { %931 = vmatpush1.bf16.msra.mxu0 %v925_v61 }
 0x196   : > { %v995_v63 = vpop.permute.xlu0 %994 }
 0x197   : > { %v993_v0 = vpop.permute.xlu1 %992  ;;  %v1000_v1 = vsel %vm3897_vm3, %v995_v63, %v997_v59 }
 0x198   : > { %v999_v3 = vsel %vm3897_vm3, %v993_v0, %v995_v63  ;;  %2957 = vmatmul.mubr.msk.bf16.vlgmr.msra.gmra.mrb[0].mxu0 %vm508_vm15, %v2952_v62  ;;  %2962 = vmatprep.subr.msk.bf16.mxu0 %vm512_vm13, %v1000_v1  ;;  %vm3912_vm3 = vcmask 916480  }
 0x199   : > { %v1005_v4 = vsel %vm512_vm13, %v999_v3, 0  ;;  %1042 = vmatprep.mubr.bf16.mxu0 %v3231_v2 }
 0x19a   : > { %1011 = vmatpush1.bf16.msra.mxu0 %v1005_v4  ;;  %v684_v6 = vpop.permute.xlu0 %683 }
 0x19b   : > { %v1056_v7 = vpop.permute.xlu1 %1055 }
 0x19d   : > { %2931 = vmatmul.mubr.msk.bf16.vlgmr.msra.gmra.mrb[0].mxu1 %vm508_vm15, %v487_v5 }
 0x19e   : > { %729 = vmatprep.mubr.bf16.mxu1 %v3231_v2  ;;  %v1058_v8 = vpop.permute.xlu0 %1057 }
 0x19f   : > { %v1060_v9 = vpop.permute.xlu1 %1059  ;;  %v1062_v12 = vsel %vm3898_vm4, %v1056_v7, %v1058_v8 }
 0x1a0   : > { %v1063_v10 = vsel %vm3898_vm4, %v1058_v8, %v1060_v9  ;;  %v1068_v19 = vsel %vm512_vm13, %v1062_v12, 0  ;;  %vm3899_vm4 = vcmask 769024  }
 0x1a1   : > { %2965 = vmatprep.subr.msk.bf16.mxu0 %vm512_vm13, %v1063_v10 }
 0x1a2   : > { %v680_v14 = vpop.permute.xlu0 %679 }
 0x1a3   : > { %v682_v15 = vpop.permute.xlu1 %681 }
 0x1a4   : > { %v686_v17 = vsel %vm685_vm1, %v680_v14, %v682_v15  ;;  %v687_v18 = vsel %vm685_vm1, %v682_v15, %v684_v6  ;;  %2963 = vmatmul.mubr.msk.bf16.vlgmr.msra.gmra.mrb[0].mxu0 %vm508_vm15, %v2958_v13 }
 0x1a5   : > { %v692_v21 = vsel %vm512_vm13, %v686_v17, 0  ;;  %2938 = vmatprep.subr.msk.bf16.mxu1 %vm512_vm13, %v687_v18  ;;  %1074 = vmatpush1.bf16.msra.mxu0 %v1068_v19 }
 0x1a6   : > { %698 = vmatpush1.bf16.msra.mxu1 %v692_v21  ;;  %v766_v23 = vpop.permute.xlu0 %765  ;;  %1105 = vmatprep.mubr.bf16.mxu0 %v3231_v2 }
 0x1a7   : > { %v764_v24 = vpop.permute.xlu1 %763 }
 0x1a8   : > { %v769_v25 = vsel %vm3912_vm3, %v764_v24, %v766_v23 }
 0x1a9   : > { %2939 = vmatmul.mubr.msk.bf16.vlgmr.msra.gmra.mrb[0].mxu1 %vm508_vm15, %v2934_v22  ;;  %2944 = vmatprep.subr.msk.bf16.mxu1 %vm512_vm13, %v769_v25 }
 0x1aa   : > { %811 = vmatprep.mubr.bf16.mxu1 %v3231_v2  ;;  %v762_v26 = vpop.permute.xlu0 %761 }
 0x1ab   : > { %v1136_v27 = vpop.permute.xlu1 %1135  ;;  %v768_v28 = vsel %vm3912_vm3, %v762_v26, %v764_v24 }
 0x1ac   : > { %v774_v29 = vsel %vm512_vm13, %v768_v28, 0 }
 0x1ad   : > { %780 = vmatpush1.bf16.msra.mxu1 %v774_v29 }
 0x1ae   : > { %v1138_v31 = vpop.permute.xlu0 %1137 }
 0x1af   : > { %v1140_v32 = vpop.permute.xlu1 %1139  ;;  %v1142_v33 = vsel %vm3899_vm4, %v1136_v27, %v1138_v31 }
 0x1b0   : > { %v1143_v34 = vsel %vm3899_vm4, %v1138_v31, %v1140_v32  ;;  %v1148_v35 = vsel %vm512_vm13, %v1142_v33, 0  ;;  %2966 = vmatmul.mubr.msk.bf16.vlgmr.msra.gmra.mrb[0].mxu0 %vm508_vm15, %v2964_v30 }
 0x1b1   : > { %2971 = vmatprep.subr.msk.bf16.mxu0 %vm512_vm13, %v1143_v34  ;;  %1185 = vmatprep.mubr.bf16.mxu0 %v3231_v2  ;;  %vm1237_vm13 = vcmask 1043592  }
 0x1b2   : > { %1154 = vmatpush1.bf16.msra.mxu0 %v1148_v35 }
 0x1b5   : > { %2945 = vmatmul.mubr.msk.bf16.vlgmr.msra.gmra.mrb[0].mxu1 %vm508_vm15, %v2940_v36 }
 0x1b6   : > { %1351 = vmatprep.mubr.bf16.mxu1 %v3231_v2 }
 0x1bc   : > { %2972 = vmatmul.mubr.msk.bf16.vlgmr.msra.gmra.mrb[0].mxu0 %vm508_vm15, %v2967_v37  ;;  %vm1238_vm15 = vcmask 1047556  }
 0x1bd   : > { %2169 = vmatprep.mubr.bf16.mxu0 %v3231_v2  ;;  %vm3536_vm4 = vmor %vm1238_vm15, %vm1237_vm13  ;;  %vm1312_vm13 = vcmask 1043456   ;;  %vm1308_vm15 = vcmask 64512  }
 0x1bf   : > { %v1211_v52 = vpop.permute.xlu0 %1210 }
 0x1c0   : > { %v1218_v54 = vpop.permute.xlu1 %1217 }
 0x1c4   : > { %v1461_v4 = vpop.permute.xlu1 %1460 }
 0x1c5   : > { %v1462_v5 = vrot.slane %v1461_v4, 4 }
 0x1c7   : > { %v1463_v8 = vsel %vm663_vm9, %v1462_v5, %v1461_v4 }
 0x1c8   : > { %v1689_v25 = vpop.permute.xlu1 %1688 }
 0x1c9   : > { %v1690_v28 = vrot.slane %v1689_v25, 4 }
 0x1cb   : > { %v1691_v30 = vsel %vm896_vm7, %v1690_v28, %v1689_v25  ;;  %v2988_v25 = vld [vmem:[%s3889_s7 + $0x4] sm:$0x3] }
 0x288   : > { %v813_v39 = vpop.f32.mrb[0].mxu1 }
 0x289   : > { %v815_v41 = vpop.f32.mrb[1].mxu1 }
 0x28a   : > { %v817_v42 = vpop.f32.mrb[2].mxu1 }
 0x28b   : > { %v818_v43 = vpop.f32.mrb[3].mxu1 }
 0x28f   : > { %v1187_v44 = vpop.f32.mrb[0].mxu0 }
 0x290   : > { %v3090_v45 = vadd.f32 %v1187_v44, %v813_v39  ;;  %v1189_v46 = vpop.f32.mrb[1].mxu0 }
 0x291   : > { %v3091_v47 = vadd.f32 %v1189_v46, %v815_v41  ;;  %v1191_v48 = vpop.f32.mrb[2].mxu0 }
 0x292   : > { %v1198_v49 = vrot.slane %v3090_v45, 4  ;;  %v1192_v50 = vpop.f32.mrb[3].mxu0 }
 0x293   : > { %v1199_v51 = vrot.slane %v3091_v47, 4 }
 0x294   : > { %1202 = vst [vmem:[%s3334_s13] sm:$0xf0] %v1198_v49 }
 0x295   : > { %1203 = vst [vmem:[%s3334_s13 + $0x8] sm:$0xf0] %v1199_v51 }
 0x29b   : > { %v3526_v53 = vld [vmem:[%s3334_s13] sm:$0xff] }
 0x29c   : > { %v3529_v55 = vld [vmem:[%s3334_s13 + $0x8] sm:$0xff]  ;;  %v1213_v56 = vmul.f32 %v1211_v52, %v3526_v53 }
 0x29d   : > { %v1214_v57 = vmul.f32 %v1211_v52, %v3529_v55 }
 0x29e   : > { %v1220_v58 = vadd.f32 %v1218_v54, %v1213_v56 }
 0x29f   : > { %v1221_v59 = vadd.f32 %v1218_v54, %v1214_v57  ;;  %v2976_v54 = vld [vmem:[%s3889_s7 + $0x2] sm:$0x3] }
 0x2a0   : > { %v1222_v60 = vmax.f32 %v1220_v58, 0.0 }
 0x2a1   : > { %v1223_v61 = vmax.f32 %v1221_v59, 0.0 }
 0x2a3   : > { %v3087_v62 = vpack.c.bf16 %v1223_v61, %v1222_v60 }
 0x2a5   : > { %1231 = vrot.lane.b32.xlu0 %v3087_v62, %s3235_s16 }
 0x2a9   : > { %1540 = vrot.lane.b32.xlu0 %v3346_v20, %s3234_s15 }
 0x317   : > { %v1232_v63 = vpop.permute.xlu0 %1231 }
 0x318   : > { %v1233_v1 = vrot.slane %v1232_v63, 4 }
 0x31a   : > { %v1234_v3 = vsel %vm432_vm5, %v1233_v1, %v1232_v63  ;;  %1241 = vst.msk [vmem:[#allocation2 + $0x8] sm:$0xf] %vm388_vm0, %v1233_v1 }
 0x31b   : > { %1240 = vst.msk [vmem:[#allocation2] sm:$0xff] %vm3536_vm4, %v1234_v3  ;;  %v1541_v12 = vpop.permute.xlu0 %1540 }
 0x31c   : > { %v1542_v14 = vrot.slane %v1541_v12, 4 }
 0x31e   : > { %v1543_v19 = vsel %vm745_vm10, %v1542_v14, %v1541_v12  ;;  %v1288_v12 = vld [vmem:[%s3889_s7] sm:$0x3] }
 0x321   : > { %v1289_v10 = vld [vmem:[#allocation2 + $0x8] sm:$0xf] }
 0x322   : > { %v3544_v6 = vld [vmem:[#allocation2] sm:$0xff]  ;;  %v2979_v15 = vcombine.low %v1289_v10, %v1289_v10  ;;  %v1467_v18 = vmul.bf16 %v1462_v5, %v1289_v10  ;;  %v3567_v24 = vld [vmem:[#allocation2 + $0x8] sm:$0xf] }
 0x323   : > { %v3548_v7 = vcombine.high %v3544_v6, %v3544_v6  ;;  %v3553_v9 = vcombine.low %v3544_v6, %v3544_v6  ;;  %v1466_v13 = vmul.bf16 %v1463_v8, %v3544_v6  ;;  %v1546_v22 = vmul.bf16 %v1543_v19, %v3544_v6 }
 0x324   : > { %v2991_v23 = vcombine.low %v1467_v18, %v1467_v18  ;;  %v1547_v27 = vmul.bf16 %v1542_v14, %v3567_v24  ;;  %v1694_v32 = vmul.bf16 %v1691_v30, %v3544_v6  ;;  %v3003_v33 = vcombine.low %v3567_v24, %v3567_v24 }
 0x325   : > { %1302 = vrot.lane.b32.xlu1 %v3548_v7, %s3240_s22  ;;  %1300 = vrot.lane.b32.xlu0 %v3553_v9, %s3240_s22  ;;  %v2990_v17 = vcombine.high %v1466_v13, %v1466_v13  ;;  %v2989_v21 = vcombine.low %v1466_v13, %v1466_v13  ;;  %v2996_v26 = vcombine.high %v1546_v22, %v1546_v22 }
 0x326   : > { %v2995_v29 = vcombine.low %v1546_v22, %v1546_v22  ;;  %v2997_v31 = vcombine.low %v1547_v27, %v1547_v27  ;;  %v3008_v34 = vcombine.high %v1694_v32, %v1694_v32  ;;  %v1695_v35 = vmul.bf16 %v1690_v28, %v3567_v24  ;;  %v1988_v22 = vld [vmem:[%s3891_s9] sm:$0xff]  ;;  %v1989_v28 = vld [vmem:[%s3891_s9 + $0x8] sm:$0xf] }
 0x327   : > { %v3007_v36 = vcombine.low %v1694_v32, %v1694_v32  ;;  %v1287_v42 = vmul.bf16 %v3346_v20, %v3544_v6 }
 0x328   : > { %v3009_v37 = vcombine.low %v1695_v35, %v1695_v35 }
 0x329   : > { %1766 = vrot.lane.b32.xlu1 %v3346_v20, %s3233_s14  ;;  %1304 = vrot.lane.b32.xlu0 %v2979_v15, %s3240_s22  ;;  %v2983_v50 = vcombine.high %v1287_v42, %v1287_v42  ;;  %v2982_v51 = vcombine.low %v1287_v42, %v1287_v42 }
 0x32b   : > { %v1369_v60 = vsel %vm1312_vm13, %v2982_v51, 0 }
 0x32d   : > { %1480 = vrot.lane.b32.xlu1 %v2990_v17, %s3243_s25  ;;  %1478 = vrot.lane.b32.xlu0 %v2989_v21, %s3243_s25 }
 0x331   : > { %1906 = vrot.lane.b32.xlu1 %v3362_v38, %s3238_s20  ;;  %1482 = vrot.lane.b32.xlu0 %v2991_v23, %s3243_s25  ;;  %v1987_v23 = vld [vmem:[%s3890_s8 + $0x8] sm:$0xf] }
 0x335   : > { %1560 = vrot.lane.b32.xlu1 %v2996_v26, %s3906_s27  ;;  %1558 = vrot.lane.b32.xlu0 %v2995_v29, %s3906_s27 }
 0x339   : > { %1628 = vrot.lane.b32.xlu1 %v3553_v9, %s3904_s21  ;;  %1562 = vrot.lane.b32.xlu0 %v2997_v31, %s3906_s27 }
 0x33d   : > { %1632 = vrot.lane.b32.xlu1 %v3003_v33, %s3904_s21  ;;  %1630 = vrot.lane.b32.xlu0 %v3548_v7, %s3904_s21 }
 0x341   : > { %1708 = vrot.lane.b32.xlu1 %v3008_v34, %s3902_s23  ;;  %1706 = vrot.lane.b32.xlu0 %v3007_v36, %s3902_s23 }
 0x345   : > { %1710 = vrot.lane.b32.xlu0 %v3009_v37, %s3902_s23 }
 0x397   : > { %v1303_v39 = vpop.permute.xlu1 %1302  ;;  %v1301_v41 = vpop.permute.xlu0 %1300 }
 0x398   : > { %v1306_v43 = vsel %vm505_vm14, %v1301_v41, %v1303_v39  ;;  %v3000_v41 = vld [vmem:[%s3889_s7 + $0x8] sm:$0x3] }
 0x399   : > { %v1314_v48 = vsel %vm1312_vm13, %v1306_v43, 0  ;;  %v3006_v43 = vld [vmem:[%s3889_s7 + $0xa] sm:$0x3] }
 0x39b   : > { %v1767_v44 = vpop.permute.xlu1 %1766  ;;  %v1305_v45 = vpop.permute.xlu0 %1304 }
 0x39c   : > { %v1768_v46 = vrot.slane %v1767_v44, 4  ;;  %v1307_v47 = vsel %vm505_vm14, %v1303_v39, %v1305_v45 }
 0x39d   : > { %2980 = vmatprep.subr.msk.bf16.mxu1 %vm1312_vm13, %v1307_v47 }
 0x39e   : > { %v1769_v49 = vsel %vm976_vm8, %v1768_v46, %v1767_v44  ;;  %1320 = vmatpush1.bf16.msra.mxu1 %v1314_v48  ;;  %v1773_v59 = vmul.bf16 %v1768_v46, %v3567_v24 }
 0x39f   : > { %v1772_v52 = vmul.bf16 %v1769_v49, %v3544_v6  ;;  %v1481_v20 = vpop.permute.xlu1 %1480  ;;  %v1479_v56 = vpop.permute.xlu0 %1478  ;;  %2984 = vmatprep.subr.msk.bf16.mxu1 %vm1312_vm13, %v2983_v50 }
 0x3a0   : > { %v3015_v4 = vcombine.low %v1773_v59, %v1773_v59  ;;  %v1484_v10 = vsel %vm685_vm1, %v1479_v56, %v1481_v20 }
 0x3a1   : > { %v3014_v57 = vcombine.high %v1772_v52, %v1772_v52  ;;  %v3013_v58 = vcombine.low %v1772_v52, %v1772_v52  ;;  %2981 = vmatmul.mubr.msk.bf16.vlgmr.msra.gmra.mrb[4].mxu1 %vm1308_vm15, %v2976_v54  ;;  %v1490_v17 = vsel %vm1312_vm13, %v1484_v10, 0  ;;  %v3012_v52 = vld [vmem:[%s3889_s7 + $0xc] sm:$0x3] }
 0x3a2   : > { %1375 = vmatpush1.bf16.msra.mxu1 %v1369_v60  ;;  %1406 = vmatprep.mubr.bf16.mxu1 %v3231_v2 }
 0x3a3   : > { %1786 = vrot.lane.b32.xlu0 %v3014_v57, %s3900_s24  ;;  %v1907_v61 = vpop.permute.xlu1 %1906  ;;  %v1483_v62 = vpop.permute.xlu0 %1482  ;;  %1784 = vrot.lane.b32.xlu1 %v3013_v58, %s3900_s24 }
 0x3a4   : > { %v1908_v63 = vrot.slane %v1907_v61, 4  ;;  %v1485_v1 = vsel %vm685_vm1, %v1481_v20, %v1483_v62 }
 0x3a5   : > { %2992 = vmatprep.subr.msk.bf16.mxu1 %vm1312_vm13, %v1485_v1 }
 0x3a6   : > { %v1909_v3 = vsel %vm3913_vm11, %v1908_v63, %v1907_v61 }
 0x3a7   : > { %1846 = vrot.lane.b32.xlu0 %v3553_v9, %s3918_s26  ;;  %v1559_v5 = vpop.permute.xlu0 %1558  ;;  %1788 = vrot.lane.b32.xlu1 %v3015_v4, %s3900_s24  ;;  %v1912_v8 = vmul.bf16 %v1909_v3, %v3544_v6  ;;  %v1561_v13 = vpop.permute.xlu1 %1560  ;;  %v1913_v6 = vmul.bf16 %v1908_v63, %v3567_v24  ;;  %v3018_v63 = vld [vmem:[%s3889_s7 + $0xe] sm:$0x3] }
 0x3a8   : > { %v1564_v24 = vsel %vm3912_vm3, %v1559_v5, %v1561_v13 }
 0x3a9   : > { %v3023_v15 = vcombine.high %v1912_v8, %v1912_v8  ;;  %v3022_v18 = vcombine.low %v1912_v8, %v1912_v8  ;;  %v3024_v21 = vcombine.low %v1913_v6, %v1913_v6  ;;  %v1570_v29 = vsel %vm1312_vm13, %v1564_v24, 0  ;;  %v3021_v8 = vld [vmem:[%s3889_s7 + $0x10] sm:$0x3] }
 0x3ab   : > { %1850 = vrot.lane.b32.xlu0 %v3003_v33, %s3918_s26  ;;  %v1563_v14 = vpop.permute.xlu0 %1562  ;;  %1848 = vrot.lane.b32.xlu1 %v3548_v7, %s3918_s26  ;;  %v1986_v7 = vld [vmem:[%s3890_s8] sm:$0xff]  ;;  %v1629_v19 = vpop.permute.xlu1 %1628 }
 0x3ac   : > { %v1565_v9 = vsel %vm3912_vm3, %v1561_v13, %v1563_v14  ;;  %v2994_v33 = vld [vmem:[%s3889_s7 + $0x6] sm:$0x3]  ;;  %vm3921_vm3 = vcmask 777216  }
 0x3ad   : > { %2985 = vmatmul.mubr.msk.bf16.vlgmr.msra.gmra.mrb[4].mxu1 %vm1308_vm15, %v1288_v12  ;;  %vm3922_vm11 = vmmov %vm3921_vm3 }
 0x3ae   : > { %1496 = vmatpush1.bf16.msra.mxu1 %v1490_v17  ;;  %1527 = vmatprep.mubr.bf16.mxu1 %v3231_v2 }
 0x3af   : > { %1926 = vrot.lane.b32.xlu0 %v3023_v15, %s3908_s28  ;;  %2998 = vmatprep.subr.msk.bf16.mxu1 %vm1312_vm13, %v1565_v9  ;;  %v1631_v26 = vpop.permute.xlu0 %1630  ;;  %v1633_v27 = vpop.permute.xlu1 %1632 }
 0x3b0   : > { %1924 = vrot.lane.b32.xlu1 %v3022_v18, %s3908_s28  ;;  %v1635_v30 = vsel %vm3911_vm12, %v1631_v26, %v1633_v27  ;;  %v1634_v32 = vsel %vm3911_vm12, %v1629_v19, %v1631_v26 }
 0x3b1   : > { %v1640_v35 = vsel %vm1312_vm13, %v1634_v32, 0 }
 0x3b3   : > { %1996 = vperm.xlu0 %3208, %v1986_v7   ;;  %v1707_v31 = vpop.permute.xlu0 %1706  ;;  %v1709_v36 = vpop.permute.xlu1 %1708  ;;  %v3029_v7 = vld.sshfl [vmem:[%s3883_s1] sm:$0x11 pattern:$0x75316420] }
 0x3b4   : > { %1928 = vrot.lane.b32.xlu1 %v3024_v21, %s3908_s28  ;;  %v1712_v39 = vsel %vm3910_vm2, %v1707_v31, %v1709_v36 }
 0x3b5   : > { %v1718_v42 = vsel %vm1312_vm13, %v1712_v39, 0 }
 0x3b7   : > { %2010 = vperm.xlu0 %3208, %v1988_v22   ;;  %v1711_v34 = vpop.permute.xlu0 %1710 }
 0x3b8   : > { %2001 = vperm.xlu1 %3209, %v1987_v23   ;;  %v1713_v37 = vsel %vm3910_vm2, %v1709_v36, %v1711_v34  ;;  %vm3919_vm2 = vcmask 785408   ;;  %v2063_v23 = vcombine.high %v3029_v7, %v3029_v7 }
 0x3b9   : > { %2993 = vmatmul.mubr.msk.bf16.vlgmr.msra.gmra.mrb[4].mxu1 %vm1308_vm15, %v2988_v25  ;;  %vm3920_vm12 = vmmov %vm3919_vm2  ;;  %v2070_v25 = vrot.slane %v3029_v7, %v3336_v11 }
 0x3ba   : > { %1576 = vmatpush1.bf16.msra.mxu1 %v1570_v29  ;;  %1607 = vmatprep.mubr.bf16.mxu1 %v3231_v2  ;;  %v2077_v26 = vrot.slane %v2063_v23, %v3336_v11 }
 0x3bb   : > { %3004 = vmatprep.subr.msk.bf16.mxu1 %vm1312_vm13, %v1635_v30  ;;  %v2079_v32 = vpack.i.b16 %v2070_v25, %v2070_v25 }
 0x3bc   : > { %2015 = vperm.xlu1 %3209, %v1989_v28  }
 0x3c5   : > { %2999 = vmatmul.mubr.msk.bf16.vlgmr.msra.gmra.mrb[4].mxu1 %vm1308_vm15, %v2994_v33  ;;  %v2086_v33 = vpack.i.b16 %v2077_v26, %v2077_v26 }
 0x3c6   : > { %1646 = vmatpush1.bf16.msra.mxu1 %v1640_v35  ;;  %1677 = vmatprep.mubr.bf16.mxu1 %v3231_v2 }
 0x3c7   : > { %3010 = vmatprep.subr.msk.bf16.mxu1 %vm1312_vm13, %v1713_v37  ;;  %v2084_v37 = vrot.slane %v2079_v32, %v3342_v16  ;;  %v2091_v39 = vrot.slane %v2086_v33, %v3342_v16 }
 0x3d1   : > { %3005 = vmatmul.mubr.msk.bf16.vlgmr.msra.gmra.mrb[4].mxu1 %vm1308_vm15, %v3000_v41  ;;  %v3722_v41 = vcombine.low %v2084_v37, %v2091_v39 }
 0x3d2   : > { %1724 = vmatpush1.bf16.msra.mxu1 %v1718_v42  ;;  %1755 = vmatprep.mubr.bf16.mxu1 %v3231_v2 }
 0x3dd   : > { %3011 = vmatmul.mubr.msk.bf16.vlgmr.msra.gmra.mrb[4].mxu1 %vm1308_vm15, %v3006_v43 }
 0x3de   : > { %1833 = vmatprep.mubr.bf16.mxu1 %v3231_v2 }
 0x415   : > { %v1787_v44 = vpop.permute.xlu0 %1786  ;;  %v1785_v45 = vpop.permute.xlu1 %1784 }
 0x416   : > { %v1790_v46 = vsel %vm3919_vm2, %v1785_v45, %v1787_v44 }
 0x417   : > { %v1796_v50 = vsel %vm1312_vm13, %v1790_v46, 0 }
 0x419   : > { %v1847_v47 = vpop.permute.xlu0 %1846  ;;  %v1789_v48 = vpop.permute.xlu1 %1788 }
 0x41a   : > { %v1791_v49 = vsel %vm3920_vm12, %v1787_v44, %v1789_v48  ;;  %vm3923_vm12 = vcmask 769024  }
 0x41b   : > { %3016 = vmatprep.subr.msk.bf16.mxu1 %vm1312_vm13, %v1791_v49  ;;  %vm3924_vm2 = vmmov %vm3923_vm12 }
 0x41c   : > { %1802 = vmatpush1.bf16.msra.mxu1 %v1796_v50 }
 0x41d   : > { %v1851_v51 = vpop.permute.xlu0 %1850  ;;  %v1849_v20 = vpop.permute.xlu1 %1848 }
 0x41e   : > { %v1852_v54 = vsel %vm3921_vm3, %v1847_v47, %v1849_v20  ;;  %v1853_v56 = vsel %vm3922_vm11, %v1849_v20, %v1851_v51  ;;  %vm394_vm11 = vcmask 271496  }
 0x41f   : > { %v1858_v57 = vsel %vm1312_vm13, %v1852_v54, 0  ;;  %3017 = vmatmul.mubr.msk.bf16.vlgmr.msra.gmra.mrb[4].mxu1 %vm1308_vm15, %v3012_v52  ;;  %3019 = vmatprep.subr.msk.bf16.mxu1 %vm1312_vm13, %v1853_v56  ;;  %395 = vst.msk [vmem:[#allocation2 + $0x14] sm:$0x3] %vm394_vm11, %v3231_v2  ;;  %vm3942_vm11 = vmmov %vm3924_vm2 }
 0x420   : > { %1864 = vmatpush1.bf16.msra.mxu1 %v1858_v57  ;;  %1895 = vmatprep.mubr.bf16.mxu1 %v3231_v2 }
 0x421   : > { %v1927_v59 = vpop.permute.xlu0 %1926 }
 0x422   : > { %v1925_v58 = vpop.permute.xlu1 %1924 }
 0x423   : > { %v1930_v62 = vsel %vm3924_vm2, %v1925_v58, %v1927_v59 }
 0x424   : > { %v1936_v1 = vsel %vm1312_vm13, %v1930_v62, 0 }
 0x426   : > { %v1929_v60 = vpop.permute.xlu1 %1928 }
 0x427   : > { %v1931_v61 = vsel %vm3923_vm12, %v1927_v59, %v1929_v60 }
 0x428   : > { %3025 = vmatprep.subr.msk.bf16.mxu1 %vm1312_vm13, %v1931_v61 }
 0x42b   : > { %3020 = vmatmul.mubr.msk.bf16.vlgmr.msra.gmra.mrb[4].mxu1 %vm1308_vm15, %v3018_v63 }
 0x42c   : > { %1942 = vmatpush1.bf16.msra.mxu1 %v1936_v1  ;;  %1973 = vmatprep.mubr.bf16.mxu1 %v3231_v2 }
 0x432   : > { %v1997_v3 = vpop.permute.xlu0 %1996 }
 0x433   : > { %v2004_v4 = vmul.f32 %v1997_v3, %v3526_v53  ;;  %v2005_v5 = vmul.f32 %v1997_v3, %v3529_v55 }
 0x436   : > { %v2011_v10 = vpop.permute.xlu0 %2010 }
 0x437   : > { %v2018_v12 = vadd.f32 %v2011_v10, %v2004_v4  ;;  %v2019_v13 = vadd.f32 %v2011_v10, %v2005_v5  ;;  %3026 = vmatmul.mubr.msk.bf16.vlgmr.msra.gmra.mrb[4].mxu1 %vm1308_vm15, %v3021_v8  ;;  %v2002_v22 = vpop.permute.xlu1 %2001  ;;  %vm3940_vm15 = vcmask 777216  }
 0x438   : > { %vm3941_vm12 = vmmov %vm3940_vm15 }
 0x439   : > { %v2022_v14 = vmax.f32 %v2018_v12, 0.0  ;;  %v2023_v9 = vmax.f32 %v2019_v13, 0.0 }
 0x43b   : > { %v3088_v15 = vpack.c.bf16 %v2023_v9, %v2022_v14  ;;  %v2016_v28 = vpop.permute.xlu1 %2015 }
 0x43d   : > { %2036 = vrot.lane.b32.xlu0 %v3088_v15, %s3235_s16 }
 0x441   : > { %2281 = vrot.lane.b32.xlu0 %v3362_v38, %s3237_s19 }
 0x445   : > { %2530 = vrot.lane.b32.xlu0 %v3362_v38, %s3236_s18 }
 0x4af   : > { %v2037_v53 = vpop.permute.xlu0 %2036 }
 0x4b0   : > { %v2040_v55 = vrot.slane %v2037_v53, 4 }
 0x4b2   : > { %v2042_v17 = vsel %vm432_vm5, %v2040_v55, %v2037_v53  ;;  %2049 = vst.msk [vmem:[#allocation2 + $0x8] sm:$0xf] %vm388_vm0, %v2040_v55  ;;  %vm3925_vm0 = vcmask 132096  }
 0x4b3   : > { %2048 = vst.msk [vmem:[#allocation2] sm:$0xff] %vm3536_vm4, %v2042_v17  ;;  %v2282_v44 = vpop.permute.xlu0 %2281  ;;  %vm3938_vm4 = vcmask 785408  }
 0x4b4   : > { %v2283_v16 = vrot.slane %v2282_v44, 4  ;;  %vm3939_vm13 = vmmov %vm3938_vm4 }
 0x4b6   : > { %v2284_v50 = vsel %vm663_vm9, %v2283_v16, %v2282_v44  ;;  %vm3934_vm9 = vcmask 908288  }
 0x4b7   : > { %v2531_v5 = vpop.permute.xlu0 %2530 }
 0x4b8   : > { %v2532_v9 = vrot.slane %v2531_v5, 4 }
 0x4b9   : > { %v2101_v51 = vld [vmem:[#allocation2 + $0x8] sm:$0xf] }
 0x4ba   : > { %v3730_v45 = vld [vmem:[#allocation2] sm:$0xff]  ;;  %v2288_v61 = vmul.bf16 %v2283_v16, %v2101_v51  ;;  %v3754_v13 = vld [vmem:[#allocation2 + $0x8] sm:$0xf]  ;;  %v2533_v53 = vsel %vm896_vm7, %v2532_v9, %v2531_v5  ;;  %vm3930_vm7 = vcmask 277504  }
 0x4bb   : > { %v2287_v54 = vmul.bf16 %v2284_v50, %v3730_v45 }
 0x50a   : > { %v1975_v6 = vpop.f32.mrb[4].mxu1 }
 0x50b   : > { %1984 = vst [vmem:[%s3334_s13 + $0x10] sm:$0xf] %v1975_v6  ;;  %v1977_v18 = vpop.f32.mrb[5].mxu1 }
 0x50c   : > { %1985 = vst [vmem:[%s3334_s13 + $0x18] sm:$0xf] %v1977_v18  ;;  %v1979_v19 = vpop.f32.mrb[6].mxu1  ;;  %v2536_v18 = vmul.bf16 %v2533_v53, %v3730_v45 }
 0x50d   : > { %v1980_v21 = vpop.f32.mrb[7].mxu1 }
 0x512   : > { %v1992_v24 = vld [vmem:[%s3334_s13 + $0x10] sm:$0xf] }
 0x513   : > { %v1993_v27 = vld [vmem:[%s3334_s13 + $0x18] sm:$0xf]  ;;  %v2006_v0 = vmul.f32 %v2002_v22, %v1992_v24 }
 0x514   : > { %v2007_v29 = vmul.f32 %v2002_v22, %v1993_v27  ;;  %v2537_v22 = vmul.bf16 %v2532_v9, %v3754_v13 }
 0x515   : > { %v2020_v30 = vadd.f32 %v2016_v28, %v2006_v0  ;;  %v2098_v0 = vmul.bf16 %v3722_v41, %v3730_v45 }
 0x516   : > { %v2021_v31 = vadd.f32 %v2016_v28, %v2007_v29 }
 0x517   : > { %v2024_v34 = vmax.f32 %v2020_v30, 0.0 }
 0x518   : > { %v2025_v35 = vmax.f32 %v2021_v31, 0.0 }
 0x51a   : > { %v3089_v36 = vpack.c.bf16 %v2025_v35, %v2024_v34 }
 0x51c   : > { %2038 = vrot.lane.b32.xlu1 %v3089_v36, %s3235_s16  ;;  %s3928_s16 = smov 110   ;;  %v3031_v36 = vld [vmem:[%s3892_s10 + $0x2] sm:$0x3] }
 0x520   : > { %2370 = vrot.lane.b32.xlu1 %v3722_v41, %s3234_s15  ;;  %s3927_s15 = smov 111  }
 0x58e   : > { %v2039_v11 = vpop.permute.xlu1 %2038 }
 0x58f   : > { %v2041_v42 = vrot.slane %v2039_v11, 4 }
 0x591   : > { %v2043_v43 = vsel %vm432_vm5, %v2041_v42, %v2039_v11  ;;  %2051 = vst.msk [vmem:[#allocation2 + $0x14] sm:$0x3] %vm3925_vm0, %v2041_v42  ;;  %vm2130_vm5 = vcmask 1045504  }
 0x592   : > { %2050 = vst.msk [vmem:[#allocation2 + $0xc] sm:$0x33] %vm3370_vm6, %v2043_v43  ;;  %v2371_v52 = vpop.permute.xlu1 %2370  ;;  %vm2126_vm6 = vcmask 97280  }
 0x593   : > { %v2372_v56 = vrot.slane %v2371_v52, 4 }
 0x595   : > { %v2373_v62 = vsel %vm745_vm10, %v2372_v56, %v2371_v52  ;;  %v2377_v14 = vmul.bf16 %v2372_v56, %v3754_v13  ;;  %vm3935_vm10 = vmmov %vm3934_vm9 }
 0x596   : > { %v2376_v4 = vmul.bf16 %v2373_v62, %v3730_v45 }
 0x598   : > { %v2102_v49 = vld [vmem:[#allocation2 + $0x14] sm:$0x3] }
 0x599   : > { %v2053_v46 = vld [vmem:[#allocation2 + $0xc] sm:$0x33]  ;;  %v3034_v40 = vcombine.low %v2101_v51, %v2102_v49  ;;  %v2290_v59 = vmul.bf16 %v2283_v16, %v2102_v49  ;;  %v3747_v3 = vld [vmem:[#allocation2 + $0x14] sm:$0x3] }
 0x59a   : > { %v3033_v47 = vcombine.high %v3730_v45, %v2053_v46  ;;  %v3032_v48 = vcombine.low %v3730_v45, %v2053_v46  ;;  %v2289_v20 = vmul.bf16 %v2284_v50, %v2053_v46  ;;  %v3741_v60 = vld [vmem:[#allocation2 + $0xc] sm:$0x33]  ;;  %v2379_v12 = vmul.bf16 %v2372_v56, %v3747_v3 }
 0x59b   : > { %v2378_v63 = vmul.bf16 %v2373_v62, %v3741_v60  ;;  %v3046_v1 = vcombine.low %v2288_v61, %v2290_v59  ;;  %v3056_v15 = vcombine.low %v3730_v45, %v3741_v60  ;;  %v3058_v55 = vcombine.low %v3754_v13, %v3747_v3 }
 0x59c   : > { %2120 = vrot.lane.b32.xlu0 %v3033_v47, %s3240_s22  ;;  %2118 = vrot.lane.b32.xlu1 %v3032_v48, %s3240_s22  ;;  %v3045_v57 = vcombine.high %v2287_v54, %v2289_v20  ;;  %v3044_v58 = vcombine.low %v2287_v54, %v2289_v20  ;;  %v3057_v17 = vcombine.high %v3730_v45, %v3741_v60 }
 0x59d   : > { %v3051_v8 = vcombine.high %v2376_v4, %v2378_v63  ;;  %v3050_v10 = vcombine.low %v2376_v4, %v2378_v63  ;;  %v2538_v6 = vmul.bf16 %v2533_v53, %v3741_v60  ;;  %v2539_v21 = vmul.bf16 %v2532_v9, %v3747_v3 }
 0x59e   : > { %v2099_v26 = vmul.bf16 %v3722_v41, %v2053_v46 }
 0x59f   : > { %v3063_v7 = vcombine.high %v2536_v18, %v2538_v6  ;;  %v3062_v19 = vcombine.low %v2536_v18, %v2538_v6  ;;  %v3064_v23 = vcombine.low %v2537_v22, %v2539_v21  ;;  %v3061_v21 = vld [vmem:[%s3892_s10 + $0xa] sm:$0x3] }
 0x5a0   : > { %2615 = vrot.lane.b32.xlu0 %v3722_v41, %s3233_s14  ;;  %2122 = vrot.lane.b32.xlu1 %v3034_v40, %s3240_s22  ;;  %s3926_s14 = smov 112   ;;  %v3037_v32 = vcombine.low %v2098_v0, %v2099_v26  ;;  %v3038_v34 = vcombine.high %v2098_v0, %v2099_v26  ;;  %s3929_s22 = smov 96  }
 0x5a2   : > { %v2190_v42 = vsel %vm2130_vm5, %v3037_v32, 0 }
 0x5a4   : > { %2308 = vrot.lane.b32.xlu0 %v3045_v57, %s3243_s25  ;;  %2306 = vrot.lane.b32.xlu1 %v3044_v58, %s3243_s25  ;;  %v2100_v57 = vld [vmem:[%s3892_s10] sm:$0x3] }
 0x5a8   : > { %2762 = vrot.lane.b32.xlu0 %v3362_v38, %s3238_s20  ;;  %2310 = vrot.lane.b32.xlu1 %v3046_v1, %s3243_s25  ;;  %v3052_v38 = vcombine.low %v2377_v14, %v2379_v12 }
 0x5ac   : > { %2397 = vrot.lane.b32.xlu0 %v3051_v8, %s3926_s14  ;;  %2395 = vrot.lane.b32.xlu1 %v3050_v10, %s3926_s14 }
 0x5b0   : > { %2470 = vrot.lane.b32.xlu0 %v3056_v15, %s3927_s15  ;;  %2399 = vrot.lane.b32.xlu1 %v3052_v38, %s3926_s14  ;;  %v3049_v38 = vld [vmem:[%s3892_s10 + $0x6] sm:$0x3] }
 0x5b4   : > { %2474 = vrot.lane.b32.xlu0 %v3058_v55, %s3927_s15  ;;  %2472 = vrot.lane.b32.xlu1 %v3057_v17, %s3927_s15 }
 0x5b8   : > { %2557 = vrot.lane.b32.xlu0 %v3063_v7, %s3928_s16  ;;  %2555 = vrot.lane.b32.xlu1 %v3062_v19, %s3928_s16  ;;  %v3055_v7 = vld [vmem:[%s3892_s10 + $0x8] sm:$0x3] }
 0x5bc   : > { %2559 = vrot.lane.b32.xlu1 %v3064_v23, %s3928_s16 }
 0x60e   : > { %v2121_v24 = vpop.permute.xlu0 %2120  ;;  %v2119_v25 = vpop.permute.xlu1 %2118 }
 0x60f   : > { %v2124_v27 = vsel %vm505_vm14, %v2119_v25, %v2121_v24 }
 0x610   : > { %v2132_v33 = vsel %vm2130_vm5, %v2124_v27, 0 }
 0x612   : > { %v2616_v28 = vpop.permute.xlu0 %2615  ;;  %v2123_v29 = vpop.permute.xlu1 %2122 }
 0x613   : > { %v2617_v30 = vrot.slane %v2616_v28, 4  ;;  %v2125_v31 = vsel %vm505_vm14, %v2121_v24, %v2123_v29  ;;  %vm3936_vm14 = vcmask 900096  }
 0x614   : > { %3035 = vmatprep.subr.msk.bf16.mxu0 %vm2130_vm5, %v2125_v31  ;;  %vm3937_vm3 = vmmov %vm3936_vm14 }
 0x615   : > { %v2618_v35 = vsel %vm976_vm8, %v2617_v30, %v2616_v28  ;;  %2138 = vmatpush1.bf16.msra.mxu0 %v2132_v33  ;;  %v2622_v16 = vmul.bf16 %v2617_v30, %v3754_v13  ;;  %v2624_v46 = vmul.bf16 %v2617_v30, %v3747_v3  ;;  %vm3931_vm8 = vcmask 916480   ;;  %v3067_v28 = vld [vmem:[%s3892_s10 + $0xc] sm:$0x3] }
 0x616   : > { %v2621_v37 = vmul.bf16 %v2618_v35, %v3730_v45  ;;  %v2623_v39 = vmul.bf16 %v2618_v35, %v3741_v60  ;;  %v2309_v41 = vpop.permute.xlu0 %2308  ;;  %3039 = vmatprep.subr.msk.bf16.mxu0 %vm2130_vm5, %v3038_v34  ;;  %v2307_v11 = vpop.permute.xlu1 %2306 }
 0x617   : > { %v3070_v51 = vcombine.low %v2622_v16, %v2624_v46  ;;  %v2312_v56 = vsel %vm685_vm1, %v2307_v11, %v2309_v41 }
 0x618   : > { %3036 = vmatmul.mubr.msk.bf16.vlgmr.msra.gmra.mrb[4].mxu0 %vm2126_vm6, %v3031_v36  ;;  %v3068_v43 = vcombine.low %v2621_v37, %v2623_v39  ;;  %v3069_v44 = vcombine.high %v2621_v37, %v2623_v39  ;;  %v2318_v62 = vsel %vm2130_vm5, %v2312_v56, 0 }
 0x619   : > { %2196 = vmatpush1.bf16.msra.mxu0 %v2190_v42  ;;  %2227 = vmatprep.mubr.bf16.mxu0 %v3231_v2  ;;  %v3076_v42 = vld [vmem:[%s3892_s10 + $0x10] sm:$0x3] }
 0x61a   : > { %v2763_v47 = vpop.permute.xlu0 %2762  ;;  %2640 = vrot.lane.b32.xlu0 %v3068_v43, %s3929_s22  ;;  %2642 = vrot.lane.b32.xlu1 %v3069_v44, %s3929_s22  ;;  %v2311_v48 = vpop.permute.xlu1 %2310 }
 0x61b   : > { %v2764_v49 = vrot.slane %v2763_v47, 4  ;;  %v2313_v50 = vsel %vm685_vm1, %v2309_v41, %v2311_v48  ;;  %vm3933_vm1 = vmmov %vm3931_vm8  ;;  %v3073_v41 = vld [vmem:[%s3892_s10 + $0xe] sm:$0x3] }
 0x61c   : > { %3047 = vmatprep.subr.msk.bf16.mxu0 %vm2130_vm5, %v2313_v50 }
 0x61d   : > { %v2765_v52 = vsel %vm3930_vm7, %v2764_v49, %v2763_v47 }
 0x61e   : > { %2644 = vrot.lane.b32.xlu0 %v3070_v51, %s3929_s22  ;;  %2702 = vrot.lane.b32.xlu1 %v3056_v15, %s3918_s26  ;;  %v2396_v40 = vpop.permute.xlu1 %2395  ;;  %v2768_v20 = vmul.bf16 %v2765_v52, %v3730_v45  ;;  %v2770_v54 = vmul.bf16 %v2765_v52, %v3741_v60  ;;  %v2398_v58 = vpop.permute.xlu0 %2397  ;;  %v2769_v45 = vmul.bf16 %v2764_v49, %v3754_v13 }
 0x61f   : > { %v2771_v60 = vmul.bf16 %v2764_v49, %v3747_v3  ;;  %v2401_v8 = vsel %vm3933_vm1, %v2396_v40, %v2398_v58  ;;  %v3043_v3 = vld [vmem:[%s3892_s10 + $0x4] sm:$0x3] }
 0x620   : > { %v3077_v63 = vcombine.low %v2768_v20, %v2770_v54  ;;  %v3078_v1 = vcombine.high %v2768_v20, %v2770_v54  ;;  %v2407_v13 = vsel %vm2130_vm5, %v2401_v8, 0 }
 0x621   : > { %v3079_v5 = vcombine.low %v2769_v45, %v2771_v60 }
 0x622   : > { %2704 = vrot.lane.b32.xlu0 %v3057_v17, %s3918_s26  ;;  %2706 = vrot.lane.b32.xlu1 %v3058_v55, %s3918_s26  ;;  %v2400_v59 = vpop.permute.xlu1 %2399  ;;  %v2471_v4 = vpop.permute.xlu0 %2470 }
 0x623   : > { %v2402_v61 = vsel %vm3931_vm8, %v2398_v58, %v2400_v59 }
 0x624   : > { %3040 = vmatmul.mubr.msk.bf16.vlgmr.msra.gmra.mrb[4].mxu0 %vm2126_vm6, %v2100_v57 }
 0x625   : > { %2324 = vmatpush1.bf16.msra.mxu0 %v2318_v62  ;;  %2355 = vmatprep.mubr.bf16.mxu0 %v3231_v2 }
 0x626   : > { %3053 = vmatprep.subr.msk.bf16.mxu0 %vm2130_vm5, %v2402_v61  ;;  %2787 = vrot.lane.b32.xlu0 %v3077_v63, %s3932_s12  ;;  %v2475_v10 = vpop.permute.xlu0 %2474  ;;  %v2473_v12 = vpop.permute.xlu1 %2472 }
 0x627   : > { %2789 = vrot.lane.b32.xlu1 %v3078_v1, %s3932_s12  ;;  %v2477_v14 = vsel %vm3934_vm9, %v2473_v12, %v2475_v10  ;;  %v2476_v15 = vsel %vm3935_vm10, %v2471_v4, %v2473_v12 }
 0x628   : > { %v2482_v55 = vsel %vm2130_vm5, %v2476_v15, 0 }
 0x62a   : > { %2791 = vrot.lane.b32.xlu0 %v3079_v5, %s3932_s12  ;;  %v2556_v9 = vpop.permute.xlu1 %2555  ;;  %v2558_v17 = vpop.permute.xlu0 %2557 }
 0x62b   : > { %v2561_v18 = vsel %vm3937_vm3, %v2556_v9, %v2558_v17 }
 0x62c   : > { %v2567_v19 = vsel %vm2130_vm5, %v2561_v18, 0 }
 0x62e   : > { %v2560_v53 = vpop.permute.xlu1 %2559 }
 0x62f   : > { %v2562_v6 = vsel %vm3936_vm14, %v2558_v17, %v2560_v53 }
 0x630   : > { %3048 = vmatmul.mubr.msk.bf16.vlgmr.msra.gmra.mrb[4].mxu0 %vm2126_vm6, %v3043_v3 }
 0x631   : > { %2413 = vmatpush1.bf16.msra.mxu0 %v2407_v13  ;;  %2444 = vmatprep.mubr.bf16.mxu0 %v3231_v2 }
 0x632   : > { %3059 = vmatprep.subr.msk.bf16.mxu0 %vm2130_vm5, %v2477_v14 }
 0x63c   : > { %3054 = vmatmul.mubr.msk.bf16.vlgmr.msra.gmra.mrb[4].mxu0 %vm2126_vm6, %v3049_v38 }
 0x63d   : > { %2488 = vmatpush1.bf16.msra.mxu0 %v2482_v55  ;;  %2519 = vmatprep.mubr.bf16.mxu0 %v3231_v2 }
 0x63e   : > { %3065 = vmatprep.subr.msk.bf16.mxu0 %vm2130_vm5, %v2562_v6 }
 0x648   : > { %3060 = vmatmul.mubr.msk.bf16.vlgmr.msra.gmra.mrb[4].mxu0 %vm2126_vm6, %v3055_v7 }
 0x649   : > { %2573 = vmatpush1.bf16.msra.mxu0 %v2567_v19  ;;  %2604 = vmatprep.mubr.bf16.mxu0 %v3231_v2 }
 0x654   : > { %3066 = vmatmul.mubr.msk.bf16.vlgmr.msra.gmra.mrb[4].mxu0 %vm2126_vm6, %v3061_v21 }
 0x655   : > { %2689 = vmatprep.mubr.bf16.mxu0 %v3231_v2 }
 0x68c   : > { %v2641_v22 = vpop.permute.xlu0 %2640  ;;  %v2643_v23 = vpop.permute.xlu1 %2642 }
 0x68d   : > { %v2646_v24 = vsel %vm3938_vm4, %v2641_v22, %v2643_v23 }
 0x68e   : > { %v2652_v0 = vsel %vm2130_vm5, %v2646_v24, 0 }
 0x690   : > { %v2645_v25 = vpop.permute.xlu0 %2644  ;;  %v2703_v26 = vpop.permute.xlu1 %2702 }
 0x691   : > { %v2647_v27 = vsel %vm3939_vm13, %v2643_v23, %v2645_v25 }
 0x692   : > { %3071 = vmatprep.subr.msk.bf16.mxu0 %vm2130_vm5, %v2647_v27 }
 0x693   : > { %2658 = vmatpush1.bf16.msra.mxu0 %v2652_v0 }
 0x694   : > { %v2705_v29 = vpop.permute.xlu0 %2704  ;;  %v2707_v30 = vpop.permute.xlu1 %2706 }
 0x695   : > { %v2708_v31 = vsel %vm3940_vm15, %v2703_v26, %v2705_v29  ;;  %v2709_v32 = vsel %vm3941_vm12, %v2705_v29, %v2707_v30 }
 0x696   : > { %v2714_v33 = vsel %vm2130_vm5, %v2708_v31, 0  ;;  %3072 = vmatmul.mubr.msk.bf16.vlgmr.msra.gmra.mrb[4].mxu0 %vm2126_vm6, %v3067_v28  ;;  %3074 = vmatprep.subr.msk.bf16.mxu0 %vm2130_vm5, %v2709_v32 }
 0x697   : > { %2720 = vmatpush1.bf16.msra.mxu0 %v2714_v33  ;;  %2751 = vmatprep.mubr.bf16.mxu0 %v3231_v2 }
 0x698   : > { %v2788_v34 = vpop.permute.xlu0 %2787 }
 0x699   : > { %v2790_v35 = vpop.permute.xlu1 %2789 }
 0x69a   : > { %v2793_v39 = vsel %vm3942_vm11, %v2788_v34, %v2790_v35 }
 0x69b   : > { %v2799_v11 = vsel %vm2130_vm5, %v2793_v39, 0 }
 0x69c   : > { %v2792_v36 = vpop.permute.xlu0 %2791 }
 0x69d   : > { %v2794_v37 = vsel %vm3924_vm2, %v2790_v35, %v2792_v36 }
 0x69e   : > { %3080 = vmatprep.subr.msk.bf16.mxu0 %vm2130_vm5, %v2794_v37 }
 0x6a2   : > { %3075 = vmatmul.mubr.msk.bf16.vlgmr.msra.gmra.mrb[4].mxu0 %vm2126_vm6, %v3073_v41 }
 0x6a3   : > { %2805 = vmatpush1.bf16.msra.mxu0 %v2799_v11  ;;  %2836 = vmatprep.mubr.bf16.mxu0 %v3231_v2 }
 0x6ae   : > { %3081 = vmatmul.mubr.msk.bf16.vlgmr.msra.gmra.mrb[4].mxu0 %vm2126_vm6, %v3076_v42 }
 0x781   : > { %v2838_v43 = vpop.f32.mrb[4].mxu0 }
 0x782   : > { %v2849_v44 = vrot.slane %v2838_v43, 4  ;;  %v2840_v16 = vpop.f32.mrb[5].mxu0 }
 0x783   : > { %v2850_v46 = vrot.slane %v2840_v16, 4  ;;  %v2842_v47 = vpop.f32.mrb[6].mxu0 }
 0x784   : > { %2853 = vst [vmem:[%s3334_s13 + $0x10] sm:$0xf0] %v2849_v44  ;;  %v2843_v48 = vpop.f32.mrb[7].mxu0 }
 0x785   : > { %2854 = vst [vmem:[%s3334_s13 + $0x18] sm:$0xf0] %v2850_v46 }
 0x786 PF: > { %s21_s17 = sadd.s32 1, %s3229_s17  }
 0x787   : > { %p18_p4 = scmp.ge.s32.totalorder %s21_s17, 4  }
 0x789   :  { %20 = sbr.rel (!%p18_p4) target bundleno = 1 (0x1), region = 118 }

</bundles_post_ra>
